<compile_context>
chip_gen: v6e
topology: v6e:2x2x1
jax: 0.10.0
libtpu: 0.0.40
codegen_flags: <defaults>
</compile_context>

<pallas_src>
import functools

import jax
import jax.numpy as jnp
from jax.experimental import pallas as pl
from jax.experimental.pallas import tpu as pltpu


def _lstm_kernel(x_ref, wih_ref, whh_ref, b_ref, h_out_ref, gx_ref,
                 *, seq_len: int, batch_pad: int, hidden_size: int,
                 input_size: int):
    """Single-invocation LSTM forward; returns only h_T.

    x_ref   : (T*Bp, I)   time-major, batch-padded input (VMEM resident)
    wih_ref : (I, 4H)     input->gates weight (transposed)
    whh_ref : (H, 4H)     hidden->gates weight (transposed)
    b_ref   : (1, 4H)     fused bias (b_ih + b_hh)
    h_out_ref : (Bp, H)   output: hidden state after the last time step
    gx_ref  : (T*Bp, 4H)  VMEM scratch for the hoisted input projection
    """
    T, B, H = seq_len, batch_pad, hidden_size

    # ---- Hoisted input projection + bias for every time step ----
    if input_size == 1:
        # (T*Bp, 1) * (1, 4H) broadcast beats a degenerate K=1 matmul.
        gx_ref[...] = x_ref[...] * wih_ref[...] + b_ref[...]
    else:
        gx_ref[...] = (jnp.dot(x_ref[...], wih_ref[...],
                               preferred_element_type=jnp.float32)
                       + b_ref[...])

    whh = whh_ref[...]                                   # (H, 4H), stays live

    # ---- Recurrence: h, c carried as values (one (8,128) vreg each) ----
    h = jnp.zeros((B, H), jnp.float32)
    c = jnp.zeros((B, H), jnp.float32)

    for t in range(T):                    # T is static -> fully unrolled
        gates = (gx_ref[t * B:(t + 1) * B, :]
                 + jnp.dot(h, whh, preferred_element_type=jnp.float32))

        # PyTorch gate order: i, f, g, o
        i_g = jax.nn.sigmoid(gates[:, 0 * H:1 * H])
        f_g = jax.nn.sigmoid(gates[:, 1 * H:2 * H])
        g_g = jnp.tanh(gates[:, 2 * H:3 * H])
        o_g = jax.nn.sigmoid(gates[:, 3 * H:4 * H])

        c = f_g * c + i_g * g_g
        h = o_g * jnp.tanh(c)

    h_out_ref[...] = h.astype(h_out_ref.dtype)           # single store


def lstm_last_hidden(x, w_ih, w_hh, b_ih, b_hh):
    """x: (B, T, I) batch_first. w_ih: (4H, I), w_hh: (4H, H), b_*: (4H,).
    Returns h_T: (B, H)  ==  nn.LSTM(x)[0][:, -1, :]."""
    B, T, I = x.shape
    H4 = w_ih.shape[0]
    H = H4 // 4

    # Pad batch to a full 8-sublane tile so all kernel tiles are unmasked.
    B_pad = max(8, ((B + 7) // 8) * 8)
    if B_pad != B:
        x = jnp.pad(x, ((0, B_pad - B), (0, 0), (0, 0)))

    # Time-major, batch-padded, flattened to a compact (T*Bp, I) slab.
    x_tm = jnp.transpose(x, (1, 0, 2)).reshape(T * B_pad, I)
    wih_t = jnp.transpose(w_ih, (1, 0))                   # (I, 4H)
    whh_t = jnp.transpose(w_hh, (1, 0))                   # (H, 4H)
    bias = (b_ih + b_hh).reshape(1, H4)                   # fused bias

    kernel = functools.partial(_lstm_kernel, seq_len=T, batch_pad=B_pad,
                               hidden_size=H, input_size=I)

    vmem = pl.BlockSpec(memory_space=pltpu.MemorySpace.VMEM)
    h_pad = pl.pallas_call(
        kernel,
        out_shape=jax.ShapeDtypeStruct((B_pad, H), x.dtype),
        in_specs=[vmem, vmem, vmem, vmem],                # fully VMEM resident
        out_specs=vmem,
        scratch_shapes=[pltpu.VMEM((T * B_pad, H4), jnp.float32)],
    )(x_tm, wih_t, whh_t, bias)

    return h_pad[:B]


class LSTMEmbedderPallas:
    """Single-layer LSTM embedder: returns out[:, -1, :] == h_T."""

    def __init__(self, key, input_size, hidden_size, num_layers=1):
        assert num_layers == 1, "only num_layers=1 (as in the spec)"
        # TODO(synk): num_layers > 1 would need the full per-step h sequence
        # as a second kernel output to feed the next layer.
        self.input_size = input_size
        self.hidden_size = hidden_size
        k = 1.0 / jnp.sqrt(hidden_size)
        ks = jax.random.split(key, 4)
        self.w_ih = jax.random.uniform(
            ks[0], (4 * hidden_size, input_size), jnp.float32, -k, k)
        self.w_hh = jax.random.uniform(
            ks[1], (4 * hidden_size, hidden_size), jnp.float32, -k, k)
        self.b_ih = jax.random.uniform(
            ks[2], (4 * hidden_size,), jnp.float32, -k, k)
        self.b_hh = jax.random.uniform(
            ks[3], (4 * hidden_size,), jnp.float32, -k, k)

    def __call__(self, x):
        return lstm_last_hidden(x, self.w_ih, self.w_hh, self.b_ih, self.b_hh)

    # pure-JAX reference (lax.scan) for the correctness check
    def reference(self, x):
        B, T, I = x.shape
        H = self.hidden_size

        def step(carry, x_t):
            h, c = carry
            gates = x_t @ self.w_ih.T + h @ self.w_hh.T + self.b_ih + self.b_hh
            i_g, f_g, g_g, o_g = jnp.split(gates, 4, axis=-1)
            i_g = jax.nn.sigmoid(i_g)
            f_g = jax.nn.sigmoid(f_g)
            g_g = jnp.tanh(g_g)
            o_g = jax.nn.sigmoid(o_g)
            c = f_g * c + i_g * g_g
            h = o_g * jnp.tanh(c)
            return (h, c), None

        h0 = jnp.zeros((B, H), jnp.float32)
        c0 = jnp.zeros((B, H), jnp.float32)
        (h_T, _), _ = jax.lax.scan(step, (h0, c0),
                                   jnp.transpose(x, (1, 0, 2)))
        return h_T.astype(x.dtype)


if __name__ == "__main__":
    key = jax.random.PRNGKey(0)
    k_x, k_params = jax.random.split(key, 2)

    batch = 4
    seq_len = 8
    input_size = 1      # matches the spec
    hidden_size = 128   # matches the spec; == 128-lane vreg width

    x = jax.random.normal(k_x, (batch, seq_len, input_size), jnp.float32)

    model = LSTMEmbedderPallas(k_params, input_size, hidden_size, num_layers=1)

    out = model(x)
    out = jax.block_until_ready(out)

    ref = model.reference(x)
    assert out.shape == (batch, hidden_size)
    assert jnp.allclose(out, ref, atol=1e-4, rtol=1e-4)

    print("KERNEL_OK")
</pallas_src>

<mosaic_0001>
module attributes {stable_mosaic.version = 11 : i64} {
  func.func @_lstm_kernel(%arg0: memref<64x1xf32, #tpu.memory_space<vmem>>, %arg1: memref<1x512xf32, #tpu.memory_space<vmem>>, %arg2: memref<128x512xf32, #tpu.memory_space<vmem>>, %arg3: memref<1x512xf32, #tpu.memory_space<vmem>>, %arg4: memref<8x128xf32, #tpu.memory_space<vmem>>, %arg5: memref<64x512xf32, #tpu.memory_space<vmem>>) attributes {dimension_semantics = [], scalar_prefetch = 0 : i64, scratch_operands = 1 : i64, tpu.core_type = #tpu.core_type<tc>} {
    %c0 = arith.constant 0 : index
    %c0_0 = arith.constant 0 : index
    %0 = vector.load %arg0[%c0, %c0_0] : memref<64x1xf32, #tpu.memory_space<vmem>>, vector<64x1xf32>
    %c0_1 = arith.constant 0 : index
    %c0_2 = arith.constant 0 : index
    %1 = vector.load %arg1[%c0_1, %c0_2] : memref<1x512xf32, #tpu.memory_space<vmem>>, vector<1x512xf32>
    %2 = vector.broadcast %0 : vector<64x1xf32> to vector<64x512xf32>
    %3 = vector.broadcast %1 : vector<1x512xf32> to vector<64x512xf32>
    %4 = arith.mulf %2, %3 : vector<64x512xf32>
    %c0_3 = arith.constant 0 : index
    %c0_4 = arith.constant 0 : index
    %5 = vector.load %arg3[%c0_3, %c0_4] : memref<1x512xf32, #tpu.memory_space<vmem>>, vector<1x512xf32>
    %6 = vector.broadcast %5 : vector<1x512xf32> to vector<64x512xf32>
    %7 = arith.addf %4, %6 : vector<64x512xf32>
    %c0_5 = arith.constant 0 : index
    %c0_6 = arith.constant 0 : index
    %8 = vector.load %arg5[%c0_5, %c0_6] : memref<64x512xf32, #tpu.memory_space<vmem>>, vector<64x512xf32>
    tpu.vector_store %arg5[%c0_5, %c0_6], %7 {strides = array<i32>} : memref<64x512xf32, #tpu.memory_space<vmem>>, vector<64x512xf32>,
    %c0_7 = arith.constant 0 : index
    %c0_8 = arith.constant 0 : index
    %9 = vector.load %arg2[%c0_7, %c0_8] : memref<128x512xf32, #tpu.memory_space<vmem>>, vector<128x512xf32>
    %cst = arith.constant 0.000000e+00 : f32
    %10 = vector.broadcast %cst : f32 to vector<8x128xf32>
    %cst_9 = arith.constant 0.000000e+00 : f32
    %11 = vector.broadcast %cst_9 : f32 to vector<8x128xf32>
    %c0_10 = arith.constant 0 : index
    %c0_11 = arith.constant 0 : index
    %12 = vector.load %arg5[%c0_10, %c0_11] : memref<64x512xf32, #tpu.memory_space<vmem>>, vector<8x512xf32>
    %cst_12 = arith.constant dense<0.000000e+00> : vector<8x512xf32>
    %13 = tpu.matmul %10, %9, %cst_12 {dimension_numbers = #tpu.dot_dimension_numbers<[1], [0], [0], [1], [0, 0, 1, 1], [], []>} : vector<8x128xf32>, vector<128x512xf32>, vector<8x512xf32> -> vector<8x512xf32>
    %14 = arith.addf %12, %13 : vector<8x512xf32>
    %15 = vector.extract_strided_slice %14 {offsets = [0, 0], sizes = [8, 128], strides = [1, 1]} : vector<8x512xf32> to vector<8x128xf32>
    %16 = arith.negf %15 : vector<8x128xf32>
    %17 = math.exp %16 : vector<8x128xf32>
    %cst_13 = arith.constant 1.000000e+00 : f32
    %18 = vector.broadcast %cst_13 : f32 to vector<8x128xf32>
    %19 = arith.addf %18, %17 : vector<8x128xf32>
    %20 = arith.divf %18, %19 : vector<8x128xf32>
    %21 = vector.extract_strided_slice %14 {offsets = [0, 128], sizes = [8, 128], strides = [1, 1]} : vector<8x512xf32> to vector<8x128xf32>
    %22 = arith.negf %21 : vector<8x128xf32>
    %23 = math.exp %22 : vector<8x128xf32>
    %cst_14 = arith.constant 1.000000e+00 : f32
    %24 = vector.broadcast %cst_14 : f32 to vector<8x128xf32>
    %25 = arith.addf %24, %23 : vector<8x128xf32>
    %26 = arith.divf %24, %25 : vector<8x128xf32>
    %27 = vector.extract_strided_slice %14 {offsets = [0, 256], sizes = [8, 128], strides = [1, 1]} : vector<8x512xf32> to vector<8x128xf32>
    %28 = math.tanh %27 : vector<8x128xf32>
    %29 = vector.extract_strided_slice %14 {offsets = [0, 384], sizes = [8, 128], strides = [1, 1]} : vector<8x512xf32> to vector<8x128xf32>
    %30 = arith.negf %29 : vector<8x128xf32>
    %31 = math.exp %30 : vector<8x128xf32>
    %cst_15 = arith.constant 1.000000e+00 : f32
    %32 = vector.broadcast %cst_15 : f32 to vector<8x128xf32>
    %33 = arith.addf %32, %31 : vector<8x128xf32>
    %34 = arith.divf %32, %33 : vector<8x128xf32>
    %35 = arith.mulf %26, %11 : vector<8x128xf32>
    %36 = arith.mulf %20, %28 : vector<8x128xf32>
    %37 = arith.addf %35, %36 : vector<8x128xf32>
    %38 = math.tanh %37 : vector<8x128xf32>
    %39 = arith.mulf %34, %38 : vector<8x128xf32>
    %c8 = arith.constant 8 : index
    %c0_16 = arith.constant 0 : index
    %40 = vector.load %arg5[%c8, %c0_16] : memref<64x512xf32, #tpu.memory_space<vmem>>, vector<8x512xf32>
    %cst_17 = arith.constant dense<0.000000e+00> : vector<8x512xf32>
    %41 = tpu.matmul %39, %9, %cst_17 {dimension_numbers = #tpu.dot_dimension_numbers<[1], [0], [0], [1], [0, 0, 1, 1], [], []>} : vector<8x128xf32>, vector<128x512xf32>, vector<8x512xf32> -> vector<8x512xf32>
    %42 = arith.addf %40, %41 : vector<8x512xf32>
    %43 = vector.extract_strided_slice %42 {offsets = [0, 0], sizes = [8, 128], strides = [1, 1]} : vector<8x512xf32> to vector<8x128xf32>
    %44 = arith.negf %43 : vector<8x128xf32>
    %45 = math.exp %44 : vector<8x128xf32>
    %cst_18 = arith.constant 1.000000e+00 : f32
    %46 = vector.broadcast %cst_18 : f32 to vector<8x128xf32>
    %47 = arith.addf %46, %45 : vector<8x128xf32>
    %48 = arith.divf %46, %47 : vector<8x128xf32>
    %49 = vector.extract_strided_slice %42 {offsets = [0, 128], sizes = [8, 128], strides = [1, 1]} : vector<8x512xf32> to vector<8x128xf32>
    %50 = arith.negf %49 : vector<8x128xf32>
    %51 = math.exp %50 : vector<8x128xf32>
    %cst_19 = arith.constant 1.000000e+00 : f32
    %52 = vector.broadcast %cst_19 : f32 to vector<8x128xf32>
    %53 = arith.addf %52, %51 : vector<8x128xf32>
    %54 = arith.divf %52, %53 : vector<8x128xf32>
    %55 = vector.extract_strided_slice %42 {offsets = [0, 256], sizes = [8, 128], strides = [1, 1]} : vector<8x512xf32> to vector<8x128xf32>
    %56 = math.tanh %55 : vector<8x128xf32>
    %57 = vector.extract_strided_slice %42 {offsets = [0, 384], sizes = [8, 128], strides = [1, 1]} : vector<8x512xf32> to vector<8x128xf32>
    %58 = arith.negf %57 : vector<8x128xf32>
    %59 = math.exp %58 : vector<8x128xf32>
    %cst_20 = arith.constant 1.000000e+00 : f32
    %60 = vector.broadcast %cst_20 : f32 to vector<8x128xf32>
    %61 = arith.addf %60, %59 : vector<8x128xf32>
    %62 = arith.divf %60, %61 : vector<8x128xf32>
    %63 = arith.mulf %54, %37 : vector<8x128xf32>
    %64 = arith.mulf %48, %56 : vector<8x128xf32>
    %65 = arith.addf %63, %64 : vector<8x128xf32>
    %66 = math.tanh %65 : vector<8x128xf32>
    %67 = arith.mulf %62, %66 : vector<8x128xf32>
    %c16 = arith.constant 16 : index
    %c0_21 = arith.constant 0 : index
    %68 = vector.load %arg5[%c16, %c0_21] : memref<64x512xf32, #tpu.memory_space<vmem>>, vector<8x512xf32>
    %cst_22 = arith.constant dense<0.000000e+00> : vector<8x512xf32>
    %69 = tpu.matmul %67, %9, %cst_22 {dimension_numbers = #tpu.dot_dimension_numbers<[1], [0], [0], [1], [0, 0, 1, 1], [], []>} : vector<8x128xf32>, vector<128x512xf32>, vector<8x512xf32> -> vector<8x512xf32>
    %70 = arith.addf %68, %69 : vector<8x512xf32>
    %71 = vector.extract_strided_slice %70 {offsets = [0, 0], sizes = [8, 128], strides = [1, 1]} : vector<8x512xf32> to vector<8x128xf32>
    %72 = arith.negf %71 : vector<8x128xf32>
    %73 = math.exp %72 : vector<8x128xf32>
    %cst_23 = arith.constant 1.000000e+00 : f32
    %74 = vector.broadcast %cst_23 : f32 to vector<8x128xf32>
    %75 = arith.addf %74, %73 : vector<8x128xf32>
    %76 = arith.divf %74, %75 : vector<8x128xf32>
    %77 = vector.extract_strided_slice %70 {offsets = [0, 128], sizes = [8, 128], strides = [1, 1]} : vector<8x512xf32> to vector<8x128xf32>
    %78 = arith.negf %77 : vector<8x128xf32>
    %79 = math.exp %78 : vector<8x128xf32>
    %cst_24 = arith.constant 1.000000e+00 : f32
    %80 = vector.broadcast %cst_24 : f32 to vector<8x128xf32>
    %81 = arith.addf %80, %79 : vector<8x128xf32>
    %82 = arith.divf %80, %81 : vector<8x128xf32>
    %83 = vector.extract_strided_slice %70 {offsets = [0, 256], sizes = [8, 128], strides = [1, 1]} : vector<8x512xf32> to vector<8x128xf32>
    %84 = math.tanh %83 : vector<8x128xf32>
    %85 = vector.extract_strided_slice %70 {offsets = [0, 384], sizes = [8, 128], strides = [1, 1]} : vector<8x512xf32> to vector<8x128xf32>
    %86 = arith.negf %85 : vector<8x128xf32>
    %87 = math.exp %86 : vector<8x128xf32>
    %cst_25 = arith.constant 1.000000e+00 : f32
    %88 = vector.broadcast %cst_25 : f32 to vector<8x128xf32>
    %89 = arith.addf %88, %87 : vector<8x128xf32>
    %90 = arith.divf %88, %89 : vector<8x128xf32>
    %91 = arith.mulf %82, %65 : vector<8x128xf32>
    %92 = arith.mulf %76, %84 : vector<8x128xf32>
    %93 = arith.addf %91, %92 : vector<8x128xf32>
    %94 = math.tanh %93 : vector<8x128xf32>
    %95 = arith.mulf %90, %94 : vector<8x128xf32>
    %c24 = arith.constant 24 : index
    %c0_26 = arith.constant 0 : index
    %96 = vector.load %arg5[%c24, %c0_26] : memref<64x512xf32, #tpu.memory_space<vmem>>, vector<8x512xf32>
    %cst_27 = arith.constant dense<0.000000e+00> : vector<8x512xf32>
    %97 = tpu.matmul %95, %9, %cst_27 {dimension_numbers = #tpu.dot_dimension_numbers<[1], [0], [0], [1], [0, 0, 1, 1], [], []>} : vector<8x128xf32>, vector<128x512xf32>, vector<8x512xf32> -> vector<8x512xf32>
    %98 = arith.addf %96, %97 : vector<8x512xf32>
    %99 = vector.extract_strided_slice %98 {offsets = [0, 0], sizes = [8, 128], strides = [1, 1]} : vector<8x512xf32> to vector<8x128xf32>
    %100 = arith.negf %99 : vector<8x128xf32>
    %101 = math.exp %100 : vector<8x128xf32>
    %cst_28 = arith.constant 1.000000e+00 : f32
    %102 = vector.broadcast %cst_28 : f32 to vector<8x128xf32>
    %103 = arith.addf %102, %101 : vector<8x128xf32>
    %104 = arith.divf %102, %103 : vector<8x128xf32>
    %105 = vector.extract_strided_slice %98 {offsets = [0, 128], sizes = [8, 128], strides = [1, 1]} : vector<8x512xf32> to vector<8x128xf32>
    %106 = arith.negf %105 : vector<8x128xf32>
    %107 = math.exp %106 : vector<8x128xf32>
    %cst_29 = arith.constant 1.000000e+00 : f32
    %108 = vector.broadcast %cst_29 : f32 to vector<8x128xf32>
    %109 = arith.addf %108, %107 : vector<8x128xf32>
    %110 = arith.divf %108, %109 : vector<8x128xf32>
    %111 = vector.extract_strided_slice %98 {offsets = [0, 256], sizes = [8, 128], strides = [1, 1]} : vector<8x512xf32> to vector<8x128xf32>
    %112 = math.tanh %111 : vector<8x128xf32>
    %113 = vector.extract_strided_slice %98 {offsets = [0, 384], sizes = [8, 128], strides = [1, 1]} : vector<8x512xf32> to vector<8x128xf32>
    %114 = arith.negf %113 : vector<8x128xf32>
    %115 = math.exp %114 : vector<8x128xf32>
    %cst_30 = arith.constant 1.000000e+00 : f32
    %116 = vector.broadcast %cst_30 : f32 to vector<8x128xf32>
    %117 = arith.addf %116, %115 : vector<8x128xf32>
    %118 = arith.divf %116, %117 : vector<8x128xf32>
    %119 = arith.mulf %110, %93 : vector<8x128xf32>
    %120 = arith.mulf %104, %112 : vector<8x128xf32>
    %121 = arith.addf %119, %120 : vector<8x128xf32>
    %122 = math.tanh %121 : vector<8x128xf32>
    %123 = arith.mulf %118, %122 : vector<8x128xf32>
    %c32 = arith.constant 32 : index
    %c0_31 = arith.constant 0 : index
    %124 = vector.load %arg5[%c32, %c0_31] : memref<64x512xf32, #tpu.memory_space<vmem>>, vector<8x512xf32>
    %cst_32 = arith.constant dense<0.000000e+00> : vector<8x512xf32>
    %125 = tpu.matmul %123, %9, %cst_32 {dimension_numbers = #tpu.dot_dimension_numbers<[1], [0], [0], [1], [0, 0, 1, 1], [], []>} : vector<8x128xf32>, vector<128x512xf32>, vector<8x512xf32> -> vector<8x512xf32>
    %126 = arith.addf %124, %125 : vector<8x512xf32>
    %127 = vector.extract_strided_slice %126 {offsets = [0, 0], sizes = [8, 128], strides = [1, 1]} : vector<8x512xf32> to vector<8x128xf32>
    %128 = arith.negf %127 : vector<8x128xf32>
    %129 = math.exp %128 : vector<8x128xf32>
    %cst_33 = arith.constant 1.000000e+00 : f32
    %130 = vector.broadcast %cst_33 : f32 to vector<8x128xf32>
    %131 = arith.addf %130, %129 : vector<8x128xf32>
    %132 = arith.divf %130, %131 : vector<8x128xf32>
    %133 = vector.extract_strided_slice %126 {offsets = [0, 128], sizes = [8, 128], strides = [1, 1]} : vector<8x512xf32> to vector<8x128xf32>
    %134 = arith.negf %133 : vector<8x128xf32>
    %135 = math.exp %134 : vector<8x128xf32>
    %cst_34 = arith.constant 1.000000e+00 : f32
    %136 = vector.broadcast %cst_34 : f32 to vector<8x128xf32>
    %137 = arith.addf %136, %135 : vector<8x128xf32>
    %138 = arith.divf %136, %137 : vector<8x128xf32>
    %139 = vector.extract_strided_slice %126 {offsets = [0, 256], sizes = [8, 128], strides = [1, 1]} : vector<8x512xf32> to vector<8x128xf32>
    %140 = math.tanh %139 : vector<8x128xf32>
    %141 = vector.extract_strided_slice %126 {offsets = [0, 384], sizes = [8, 128], strides = [1, 1]} : vector<8x512xf32> to vector<8x128xf32>
    %142 = arith.negf %141 : vector<8x128xf32>
    %143 = math.exp %142 : vector<8x128xf32>
    %cst_35 = arith.constant 1.000000e+00 : f32
    %144 = vector.broadcast %cst_35 : f32 to vector<8x128xf32>
    %145 = arith.addf %144, %143 : vector<8x128xf32>
    %146 = arith.divf %144, %145 : vector<8x128xf32>
    %147 = arith.mulf %138, %121 : vector<8x128xf32>
    %148 = arith.mulf %132, %140 : vector<8x128xf32>
    %149 = arith.addf %147, %148 : vector<8x128xf32>
    %150 = math.tanh %149 : vector<8x128xf32>
    %151 = arith.mulf %146, %150 : vector<8x128xf32>
    %c40 = arith.constant 40 : index
    %c0_36 = arith.constant 0 : index
    %152 = vector.load %arg5[%c40, %c0_36] : memref<64x512xf32, #tpu.memory_space<vmem>>, vector<8x512xf32>
    %cst_37 = arith.constant dense<0.000000e+00> : vector<8x512xf32>
    %153 = tpu.matmul %151, %9, %cst_37 {dimension_numbers = #tpu.dot_dimension_numbers<[1], [0], [0], [1], [0, 0, 1, 1], [], []>} : vector<8x128xf32>, vector<128x512xf32>, vector<8x512xf32> -> vector<8x512xf32>
    %154 = arith.addf %152, %153 : vector<8x512xf32>
    %155 = vector.extract_strided_slice %154 {offsets = [0, 0], sizes = [8, 128], strides = [1, 1]} : vector<8x512xf32> to vector<8x128xf32>
    %156 = arith.negf %155 : vector<8x128xf32>
    %157 = math.exp %156 : vector<8x128xf32>
    %cst_38 = arith.constant 1.000000e+00 : f32
    %158 = vector.broadcast %cst_38 : f32 to vector<8x128xf32>
    %159 = arith.addf %158, %157 : vector<8x128xf32>
    %160 = arith.divf %158, %159 : vector<8x128xf32>
    %161 = vector.extract_strided_slice %154 {offsets = [0, 128], sizes = [8, 128], strides = [1, 1]} : vector<8x512xf32> to vector<8x128xf32>
    %162 = arith.negf %161 : vector<8x128xf32>
    %163 = math.exp %162 : vector<8x128xf32>
    %cst_39 = arith.constant 1.000000e+00 : f32
    %164 = vector.broadcast %cst_39 : f32 to vector<8x128xf32>
    %165 = arith.addf %164, %163 : vector<8x128xf32>
    %166 = arith.divf %164, %165 : vector<8x128xf32>
    %167 = vector.extract_strided_slice %154 {offsets = [0, 256], sizes = [8, 128], strides = [1, 1]} : vector<8x512xf32> to vector<8x128xf32>
    %168 = math.tanh %167 : vector<8x128xf32>
    %169 = vector.extract_strided_slice %154 {offsets = [0, 384], sizes = [8, 128], strides = [1, 1]} : vector<8x512xf32> to vector<8x128xf32>
    %170 = arith.negf %169 : vector<8x128xf32>
    %171 = math.exp %170 : vector<8x128xf32>
    %cst_40 = arith.constant 1.000000e+00 : f32
    %172 = vector.broadcast %cst_40 : f32 to vector<8x128xf32>
    %173 = arith.addf %172, %171 : vector<8x128xf32>
    %174 = arith.divf %172, %173 : vector<8x128xf32>
    %175 = arith.mulf %166, %149 : vector<8x128xf32>
    %176 = arith.mulf %160, %168 : vector<8x128xf32>
    %177 = arith.addf %175, %176 : vector<8x128xf32>
    %178 = math.tanh %177 : vector<8x128xf32>
    %179 = arith.mulf %174, %178 : vector<8x128xf32>
    %c48 = arith.constant 48 : index
    %c0_41 = arith.constant 0 : index
    %180 = vector.load %arg5[%c48, %c0_41] : memref<64x512xf32, #tpu.memory_space<vmem>>, vector<8x512xf32>
    %cst_42 = arith.constant dense<0.000000e+00> : vector<8x512xf32>
    %181 = tpu.matmul %179, %9, %cst_42 {dimension_numbers = #tpu.dot_dimension_numbers<[1], [0], [0], [1], [0, 0, 1, 1], [], []>} : vector<8x128xf32>, vector<128x512xf32>, vector<8x512xf32> -> vector<8x512xf32>
    %182 = arith.addf %180, %181 : vector<8x512xf32>
    %183 = vector.extract_strided_slice %182 {offsets = [0, 0], sizes = [8, 128], strides = [1, 1]} : vector<8x512xf32> to vector<8x128xf32>
    %184 = arith.negf %183 : vector<8x128xf32>
    %185 = math.exp %184 : vector<8x128xf32>
    %cst_43 = arith.constant 1.000000e+00 : f32
    %186 = vector.broadcast %cst_43 : f32 to vector<8x128xf32>
    %187 = arith.addf %186, %185 : vector<8x128xf32>
    %188 = arith.divf %186, %187 : vector<8x128xf32>
    %189 = vector.extract_strided_slice %182 {offsets = [0, 128], sizes = [8, 128], strides = [1, 1]} : vector<8x512xf32> to vector<8x128xf32>
    %190 = arith.negf %189 : vector<8x128xf32>
    %191 = math.exp %190 : vector<8x128xf32>
    %cst_44 = arith.constant 1.000000e+00 : f32
    %192 = vector.broadcast %cst_44 : f32 to vector<8x128xf32>
    %193 = arith.addf %192, %191 : vector<8x128xf32>
    %194 = arith.divf %192, %193 : vector<8x128xf32>
    %195 = vector.extract_strided_slice %182 {offsets = [0, 256], sizes = [8, 128], strides = [1, 1]} : vector<8x512xf32> to vector<8x128xf32>
    %196 = math.tanh %195 : vector<8x128xf32>
    %197 = vector.extract_strided_slice %182 {offsets = [0, 384], sizes = [8, 128], strides = [1, 1]} : vector<8x512xf32> to vector<8x128xf32>
    %198 = arith.negf %197 : vector<8x128xf32>
    %199 = math.exp %198 : vector<8x128xf32>
    %cst_45 = arith.constant 1.000000e+00 : f32
    %200 = vector.broadcast %cst_45 : f32 to vector<8x128xf32>
    %201 = arith.addf %200, %199 : vector<8x128xf32>
    %202 = arith.divf %200, %201 : vector<8x128xf32>
    %203 = arith.mulf %194, %177 : vector<8x128xf32>
    %204 = arith.mulf %188, %196 : vector<8x128xf32>
    %205 = arith.addf %203, %204 : vector<8x128xf32>
    %206 = math.tanh %205 : vector<8x128xf32>
    %207 = arith.mulf %202, %206 : vector<8x128xf32>
    %c56 = arith.constant 56 : index
    %c0_46 = arith.constant 0 : index
    %208 = vector.load %arg5[%c56, %c0_46] : memref<64x512xf32, #tpu.memory_space<vmem>>, vector<8x512xf32>
    %cst_47 = arith.constant dense<0.000000e+00> : vector<8x512xf32>
    %209 = tpu.matmul %207, %9, %cst_47 {dimension_numbers = #tpu.dot_dimension_numbers<[1], [0], [0], [1], [0, 0, 1, 1], [], []>} : vector<8x128xf32>, vector<128x512xf32>, vector<8x512xf32> -> vector<8x512xf32>
    %210 = arith.addf %208, %209 : vector<8x512xf32>
    %211 = vector.extract_strided_slice %210 {offsets = [0, 0], sizes = [8, 128], strides = [1, 1]} : vector<8x512xf32> to vector<8x128xf32>
    %212 = arith.negf %211 : vector<8x128xf32>
    %213 = math.exp %212 : vector<8x128xf32>
    %cst_48 = arith.constant 1.000000e+00 : f32
    %214 = vector.broadcast %cst_48 : f32 to vector<8x128xf32>
    %215 = arith.addf %214, %213 : vector<8x128xf32>
    %216 = arith.divf %214, %215 : vector<8x128xf32>
    %217 = vector.extract_strided_slice %210 {offsets = [0, 128], sizes = [8, 128], strides = [1, 1]} : vector<8x512xf32> to vector<8x128xf32>
    %218 = arith.negf %217 : vector<8x128xf32>
    %219 = math.exp %218 : vector<8x128xf32>
    %cst_49 = arith.constant 1.000000e+00 : f32
    %220 = vector.broadcast %cst_49 : f32 to vector<8x128xf32>
    %221 = arith.addf %220, %219 : vector<8x128xf32>
    %222 = arith.divf %220, %221 : vector<8x128xf32>
    %223 = vector.extract_strided_slice %210 {offsets = [0, 256], sizes = [8, 128], strides = [1, 1]} : vector<8x512xf32> to vector<8x128xf32>
    %224 = math.tanh %223 : vector<8x128xf32>
    %225 = vector.extract_strided_slice %210 {offsets = [0, 384], sizes = [8, 128], strides = [1, 1]} : vector<8x512xf32> to vector<8x128xf32>
    %226 = arith.negf %225 : vector<8x128xf32>
    %227 = math.exp %226 : vector<8x128xf32>
    %cst_50 = arith.constant 1.000000e+00 : f32
    %228 = vector.broadcast %cst_50 : f32 to vector<8x128xf32>
    %229 = arith.addf %228, %227 : vector<8x128xf32>
    %230 = arith.divf %228, %229 : vector<8x128xf32>
    %231 = arith.mulf %222, %205 : vector<8x128xf32>
    %232 = arith.mulf %216, %224 : vector<8x128xf32>
    %233 = arith.addf %231, %232 : vector<8x128xf32>
    %234 = math.tanh %233 : vector<8x128xf32>
    %235 = arith.mulf %230, %234 : vector<8x128xf32>
    %c0_51 = arith.constant 0 : index
    %c0_52 = arith.constant 0 : index
    %236 = vector.load %arg4[%c0_51, %c0_52] : memref<8x128xf32, #tpu.memory_space<vmem>>, vector<8x128xf32>
    tpu.vector_store %arg4[%c0_51, %c0_52], %235 {strides = array<i32>} : memref<8x128xf32, #tpu.memory_space<vmem>>, vector<8x128xf32>,
    return
  }
}

</mosaic_0001>

<bundles_post_ra>
// kernel: tpu_custom_call.1
= control target key start
LH: loop header
LB: loop body
LE: loop exit
PB: predicated region body
PF: predicated region fallthrough
CT: control target
= control target key end

     0   :  { %9 = vsyncpa [#allocation4], 0  ;;  %s2917_s0 = inlined_call_operand.vmem [shape: f32[64,1], index: 0, kind: input, shape index: {}]   ;;  %s2918_s1 = inlined_call_operand.vmem [shape: f32[1,512], index: 1, kind: input, shape index: {}]   ;;  %s2919_s2 = inlined_call_operand.hbm [shape: f32[128,512], index: 2, kind: input, shape index: {}]   ;;  %s2920_s3 = inlined_call_operand.vmem [shape: f32[1,512], index: 3, kind: input, shape index: {}]   ;;  %s2921_s4 = inlined_call_operand.hbm [shape: f32[8,128], index: 4, kind: output, shape index: {}]  }
   0x1   :  { %10 = vsyncpa [#allocation5], 0  ;;  %s1960_s15 = smov [#allocation3]  }
   0x2   :  { %s20_s16 = sshll.u32 %s1960_s15, 4  ;;  %s21_s16 = int_to_ptr.vmem [resolvable:$true] %s20_s16 }
   0x3   :  { %s1924_s17 = scalar_lea.vmem %s21_s16, 8192  ;;  %p1929_p1 = scmp.lt.s32.totalorder %s21_s16, %s21_s16 }
   0x4   :  { %p1925_p0 = scmp.ne.s32.totalorder %s21_s16, %s1924_s17  ;;  %p1930_p2 = scmp.lt.s32.totalorder %s1924_s17, %s1924_s17 }
   0x6   :  { %p1931_p3 = por %p1930_p2, %p1929_p1 }
   0x8   :  { %p1932_p4 = pnand %p1931_p3, %p1925_p0 }
   0xa   :  { %1935 = shalt.err (!%p1932_p4)
}
   0xb   :  { %s1961_s18 = smov 512   ;;  %s1962_s19 = smov 32  }
   0xc   :  { %26 = dma.hbm_to_vmem [thread:$0]  %s2919_s2, 8192, %s21_s16, [#allocation4], %s1961_s18, %s1961_s18, %s1962_s19  }
   0xd   :  { %1956 = dma.done.wait [#allocation4], 8192  }
   0xe   :  { %1957 = vsyncadd [#allocation4], 4294959104  ;;  %v2922_v0 = vmov 0.0   ;;  %v1964_v1 = vmov 0   ;;  %v1996_v2 = vld [vmem:[#allocation3 + $0x1e8] sm:$0xff]  ;;  %v1998_v3 = vld [vmem:[#allocation3 + $0x1f8] sm:$0xff] }
   0xf   :  { %352 = vmatprep.mubr.f32.mxu0 %v2922_v0  ;;  %423 = vmatprep.mubr.f32.mxu1 %v2922_v0  ;;  %3035 = vst [vmem:[#allocation9_spill] sm:$0xff] %v1996_v2  ;;  %3036 = vst [vmem:[#allocation10_spill] sm:$0xff] %v1998_v3  ;;  %v2000_v4 = vld [vmem:[#allocation3 + $0x1e0] sm:$0xff]  ;;  %v2004_v5 = vld [vmem:[#allocation3 + $0x1f0] sm:$0xff] }
  0x10   :  { %1722 = vset.pattern.permute.xlu0 %v1964_v1  ;;  %1723 = vset.pattern.permute.xlu1 %v1964_v1  ;;  %v2006_v6 = vld [vmem:[#allocation3 + $0x1c8] sm:$0xff]  ;;  %v2008_v7 = vld [vmem:[#allocation3 + $0x1d8] sm:$0xff]  ;;  %v2012_v8 = vld [vmem:[#allocation3 + $0x1c0] sm:$0xff] }
  0x11   :  { %288 = vmatprep.subr.mxu0 %v1996_v2  ;;  %359 = vmatprep.subr.mxu1 %v1998_v3  ;;  %v2014_v9 = vld [vmem:[#allocation3 + $0x1d0] sm:$0xff]  ;;  %v2016_v10 = vld [vmem:[#allocation3 + $0x1a8] sm:$0xff]  ;;  %v2020_v11 = vld [vmem:[#allocation3 + $0x1b8] sm:$0xff] }
  0x12   :  { %289 = vmatpush1.msra.mxu0 %v2000_v4  ;;  %360 = vmatpush1.msra.mxu1 %v2004_v5  ;;  %v2022_v12 = vld [vmem:[#allocation3 + $0x1a0] sm:$0xff]  ;;  %v2024_v13 = vld [vmem:[#allocation3 + $0x1b0] sm:$0xff]  ;;  %v2028_v14 = vld [vmem:[#allocation3 + $0x188] sm:$0xff] }
  0x13   :  { %290 = vmatprep.subr.mxu0 %v2006_v6  ;;  %361 = vmatprep.subr.mxu1 %v2008_v7  ;;  %v2030_v15 = vld [vmem:[#allocation3 + $0x198] sm:$0xff]  ;;  %v2034_v16 = vld [vmem:[#allocation3 + $0x180] sm:$0xff]  ;;  %v2036_v17 = vld [vmem:[#allocation3 + $0x190] sm:$0xff] }
  0x14   :  { %291 = vmatpush1.msra.mxu0 %v2012_v8  ;;  %362 = vmatpush1.msra.mxu1 %v2014_v9  ;;  %v2040_v18 = vld [vmem:[#allocation3 + $0x168] sm:$0xff]  ;;  %v2042_v19 = vld [vmem:[#allocation3 + $0x178] sm:$0xff]  ;;  %v2046_v20 = vld [vmem:[#allocation3 + $0x160] sm:$0xff] }
  0x15   :  { %292 = vmatprep.subr.mxu0 %v2016_v10  ;;  %363 = vmatprep.subr.mxu1 %v2020_v11  ;;  %v2048_v21 = vld [vmem:[#allocation3 + $0x170] sm:$0xff]  ;;  %v2052_v22 = vld [vmem:[#allocation3 + $0x148] sm:$0xff]  ;;  %v2054_v23 = vld [vmem:[#allocation3 + $0x158] sm:$0xff] }
  0x16   :  { %293 = vmatpush1.msra.mxu0 %v2022_v12  ;;  %364 = vmatpush1.msra.mxu1 %v2024_v13  ;;  %v2058_v24 = vld [vmem:[#allocation3 + $0x140] sm:$0xff]  ;;  %v2060_v25 = vld [vmem:[#allocation3 + $0x150] sm:$0xff]  ;;  %v2064_v26 = vld [vmem:[#allocation3 + $0x128] sm:$0xff] }
  0x17   :  { %294 = vmatprep.subr.mxu0 %v2028_v14  ;;  %365 = vmatprep.subr.mxu1 %v2030_v15  ;;  %v2066_v27 = vld [vmem:[#allocation3 + $0x138] sm:$0xff]  ;;  %v2070_v28 = vld [vmem:[#allocation3 + $0x120] sm:$0xff]  ;;  %v2072_v29 = vld [vmem:[#allocation3 + $0x130] sm:$0xff] }
  0x18   :  { %295 = vmatpush1.msra.mxu0 %v2034_v16  ;;  %366 = vmatpush1.msra.mxu1 %v2036_v17  ;;  %v2076_v30 = vld [vmem:[#allocation3 + $0x108] sm:$0xff]  ;;  %v2078_v31 = vld [vmem:[#allocation3 + $0x118] sm:$0xff]  ;;  %v2082_v32 = vld [vmem:[#allocation3 + $0x100] sm:$0xff] }
  0x19   :  { %296 = vmatprep.subr.mxu0 %v2040_v18  ;;  %367 = vmatprep.subr.mxu1 %v2042_v19  ;;  %v2084_v33 = vld [vmem:[#allocation3 + $0x110] sm:$0xff]  ;;  %v2088_v34 = vld [vmem:[#allocation3 + $0xe8] sm:$0xff]  ;;  %v2090_v35 = vld [vmem:[#allocation3 + $0xf8] sm:$0xff] }
  0x1a   :  { %297 = vmatpush1.msra.mxu0 %v2046_v20  ;;  %368 = vmatpush1.msra.mxu1 %v2048_v21  ;;  %v2094_v36 = vld [vmem:[#allocation3 + $0xe0] sm:$0xff]  ;;  %v2096_v37 = vld [vmem:[#allocation3 + $0xf0] sm:$0xff]  ;;  %v2100_v38 = vld [vmem:[#allocation3 + $0xc8] sm:$0xff] }
  0x1b   :  { %298 = vmatprep.subr.mxu0 %v2052_v22  ;;  %369 = vmatprep.subr.mxu1 %v2054_v23  ;;  %v2102_v39 = vld [vmem:[#allocation3 + $0xd8] sm:$0xff]  ;;  %v2106_v40 = vld [vmem:[#allocation3 + $0xc0] sm:$0xff]  ;;  %v2108_v41 = vld [vmem:[#allocation3 + $0xd0] sm:$0xff] }
  0x1c   :  { %299 = vmatpush1.msra.mxu0 %v2058_v24  ;;  %370 = vmatpush1.msra.mxu1 %v2060_v25  ;;  %v2112_v42 = vld [vmem:[#allocation3 + $0xa8] sm:$0xff]  ;;  %v2114_v43 = vld [vmem:[#allocation3 + $0xb8] sm:$0xff]  ;;  %v2118_v44 = vld [vmem:[#allocation3 + $0xa0] sm:$0xff] }
  0x1d   :  { %300 = vmatprep.subr.mxu0 %v2064_v26  ;;  %371 = vmatprep.subr.mxu1 %v2066_v27  ;;  %3037 = vst [vmem:[#allocation11_spill] sm:$0xff] %v2118_v44  ;;  %v2120_v45 = vld [vmem:[#allocation3 + $0xb0] sm:$0xff]  ;;  %v2124_v46 = vld [vmem:[#allocation3 + $0x88] sm:$0xff]  ;;  %v2126_v47 = vld [vmem:[#allocation3 + $0x98] sm:$0xff] }
  0x1e   :  { %301 = vmatpush1.msra.mxu0 %v2070_v28  ;;  %372 = vmatpush1.msra.mxu1 %v2072_v29  ;;  %3038 = vst [vmem:[#allocation12_spill] sm:$0xff] %v2120_v45  ;;  %3039 = vst [vmem:[#allocation13_spill] sm:$0xff] %v2124_v46  ;;  %v2130_v48 = vld [vmem:[#allocation3 + $0x80] sm:$0xff]  ;;  %v2132_v49 = vld [vmem:[#allocation3 + $0x90] sm:$0xff] }
  0x1f   :  { %302 = vmatprep.subr.mxu0 %v2076_v30  ;;  %373 = vmatprep.subr.mxu1 %v2078_v31  ;;  %3040 = vst [vmem:[#allocation14_spill] sm:$0xff] %v2126_v47  ;;  %3041 = vst [vmem:[#allocation15_spill] sm:$0xff] %v2130_v48  ;;  %v2136_v50 = vld [vmem:[#allocation3 + $0x68] sm:$0xff]  ;;  %v2138_v51 = vld [vmem:[#allocation3 + $0x78] sm:$0xff] }
  0x20   :  { %303 = vmatpush1.msra.mxu0 %v2082_v32  ;;  %374 = vmatpush1.msra.mxu1 %v2084_v33  ;;  %3042 = vst [vmem:[#allocation16_spill] sm:$0xff] %v2132_v49  ;;  %3043 = vst [vmem:[#allocation17_spill] sm:$0xff] %v2136_v50  ;;  %v2142_v52 = vld [vmem:[#allocation3 + $0x60] sm:$0xff]  ;;  %v2144_v53 = vld [vmem:[#allocation3 + $0x70] sm:$0xff] }
  0x21   :  { %304 = vmatprep.subr.mxu0 %v2088_v34  ;;  %375 = vmatprep.subr.mxu1 %v2090_v35  ;;  %3044 = vst [vmem:[#allocation18_spill] sm:$0xff] %v2138_v51  ;;  %3045 = vst [vmem:[#allocation19_spill] sm:$0xff] %v2142_v52  ;;  %v2148_v54 = vld [vmem:[#allocation3 + $0x48] sm:$0xff]  ;;  %v2150_v55 = vld [vmem:[#allocation3 + $0x58] sm:$0xff] }
  0x22   :  { %305 = vmatpush1.msra.mxu0 %v2094_v36  ;;  %376 = vmatpush1.msra.mxu1 %v2096_v37  ;;  %3046 = vst [vmem:[#allocation20_spill] sm:$0xff] %v2144_v53  ;;  %3047 = vst [vmem:[#allocation21_spill] sm:$0xff] %v2148_v54  ;;  %v2154_v56 = vld [vmem:[#allocation3 + $0x40] sm:$0xff]  ;;  %v2156_v57 = vld [vmem:[#allocation3 + $0x50] sm:$0xff] }
  0x23   :  { %306 = vmatprep.subr.mxu0 %v2100_v38  ;;  %377 = vmatprep.subr.mxu1 %v2102_v39  ;;  %3048 = vst [vmem:[#allocation22_spill] sm:$0xff] %v2150_v55  ;;  %3049 = vst [vmem:[#allocation23_spill] sm:$0xff] %v2154_v56  ;;  %v2160_v58 = vld [vmem:[#allocation3 + $0x28] sm:$0xff]  ;;  %v2162_v59 = vld [vmem:[#allocation3 + $0x38] sm:$0xff] }
  0x24   :  { %307 = vmatpush1.msra.mxu0 %v2106_v40  ;;  %378 = vmatpush1.msra.mxu1 %v2108_v41  ;;  %3050 = vst [vmem:[#allocation24_spill] sm:$0xff] %v2156_v57  ;;  %3051 = vst [vmem:[#allocation25_spill] sm:$0xff] %v2160_v58  ;;  %v2166_v60 = vld [vmem:[#allocation3 + $0x20] sm:$0xff]  ;;  %v2168_v61 = vld [vmem:[#allocation3 + $0x30] sm:$0xff] }
  0x25   :  { %308 = vmatprep.subr.mxu0 %v2112_v42  ;;  %379 = vmatprep.subr.mxu1 %v2114_v43  ;;  %3052 = vst [vmem:[#allocation26_spill] sm:$0xff] %v2162_v59  ;;  %3053 = vst [vmem:[#allocation27_spill] sm:$0xff] %v2166_v60  ;;  %v2172_v62 = vld [vmem:[#allocation3 + $0x8] sm:$0xff]  ;;  %v2174_v63 = vld [vmem:[#allocation3 + $0x18] sm:$0xff] }
  0x26   :  { %309 = vmatpush1.msra.mxu0 %v2118_v44  ;;  %380 = vmatpush1.msra.mxu1 %v2120_v45  ;;  %3054 = vst [vmem:[#allocation28_spill] sm:$0xff] %v2168_v61  ;;  %3055 = vst [vmem:[#allocation29_spill] sm:$0xff] %v2172_v62  ;;  %v2178_v1 = vld [vmem:[#allocation3] sm:$0xff]  ;;  %v2180_v0 = vld [vmem:[#allocation3 + $0x10] sm:$0xff] }
  0x27   :  { %310 = vmatprep.subr.mxu0 %v2124_v46  ;;  %381 = vmatprep.subr.mxu1 %v2126_v47  ;;  %3056 = vst [vmem:[#allocation30_spill] sm:$0xff] %v2174_v63  ;;  %3057 = vst [vmem:[#allocation31_spill] sm:$0xff] %v2178_v1 }
  0x28   :  { %311 = vmatpush1.msra.mxu0 %v2130_v48  ;;  %382 = vmatpush1.msra.mxu1 %v2132_v49  ;;  %3058 = vst [vmem:[#allocation32_spill] sm:$0xff] %v2180_v0 }
  0x29   :  { %312 = vmatprep.subr.mxu0 %v2136_v50  ;;  %383 = vmatprep.subr.mxu1 %v2138_v51 }
  0x2a   :  { %313 = vmatpush1.msra.mxu0 %v2142_v52  ;;  %384 = vmatpush1.msra.mxu1 %v2144_v53 }
  0x2b   :  { %314 = vmatprep.subr.mxu0 %v2148_v54  ;;  %385 = vmatprep.subr.mxu1 %v2150_v55 }
  0x2c   :  { %315 = vmatpush1.msra.mxu0 %v2154_v56  ;;  %386 = vmatpush1.msra.mxu1 %v2156_v57  ;;  %v32_v57 = vld [vmem:[%s2917_s0] sm:$0xff] }
  0x2d   :  { %316 = vmatprep.subr.mxu0 %v2160_v58  ;;  %387 = vmatprep.subr.mxu1 %v2162_v59  ;;  %v3059_v59 = vmov 0.0  }
  0x2e   :  { %317 = vmatpush1.msra.mxu0 %v2166_v60  ;;  %388 = vmatpush1.msra.mxu1 %v2168_v61 }
  0x2f   :  { %318 = vmatprep.subr.mxu0 %v2172_v62  ;;  %389 = vmatprep.subr.mxu1 %v2174_v63  ;;  %v33_v62 = vld [vmem:[%s2917_s0 + $0x8] sm:$0xff] }
  0x30   :  { %319 = vmatpush1.msra.mxu0 %v2178_v1  ;;  %390 = vmatpush1.msra.mxu1 %v2180_v0 }
  0x31   :  { %353 = vmatmul.mubr.f32.vlgmr.msra.gmra.mxu0 %v3059_v59  ;;  %424 = vmatmul.mubr.f32.vlgmr.msra.gmra.mxu1 %v3059_v59 }
  0x32   :  { %43 = vperm.xlu0 %1722, %v32_v57   ;;  %462 = vmatprep.subr.mxu0 %v1996_v2  ;;  %v36_v57 = vld [vmem:[%s2917_s0 + $0x20] sm:$0xff] }
  0x33   :  { %533 = vmatprep.subr.mxu1 %v1998_v3  ;;  %463 = vmatpush1.msra.mxu0 %v2000_v4 }
  0x34   :  { %534 = vmatpush1.msra.mxu1 %v2004_v5  ;;  %464 = vmatprep.subr.mxu0 %v2006_v6 }
  0x35   :  { %535 = vmatprep.subr.mxu1 %v2008_v7  ;;  %465 = vmatpush1.msra.mxu0 %v2012_v8 }
  0x36   :  { %48 = vperm.xlu0 %1722, %v33_v62   ;;  %536 = vmatpush1.msra.mxu1 %v2014_v9  ;;  %v38_v62 = vld [vmem:[%s2917_s0 + $0x30] sm:$0xff] }
  0x37   :  { %466 = vmatprep.subr.mxu0 %v2016_v10  ;;  %537 = vmatprep.subr.mxu1 %v2020_v11 }
  0x38   :  { %467 = vmatpush1.msra.mxu0 %v2022_v12  ;;  %538 = vmatpush1.msra.mxu1 %v2024_v13 }
  0x39   :  { %468 = vmatprep.subr.mxu0 %v2028_v14  ;;  %539 = vmatprep.subr.mxu1 %v2030_v15 }
  0x3a   :  { %63 = vperm.xlu0 %1722, %v36_v57   ;;  %469 = vmatpush1.msra.mxu0 %v2034_v16  ;;  %v3060_v57 = vld [vmem:[#allocation24_spill] sm:$0xff] }
  0x3b   :  { %540 = vmatpush1.msra.mxu1 %v2036_v17  ;;  %470 = vmatprep.subr.mxu0 %v2040_v18 }
  0x3c   :  { %541 = vmatprep.subr.mxu1 %v2042_v19  ;;  %471 = vmatpush1.msra.mxu0 %v2046_v20 }
  0x3d   :  { %542 = vmatpush1.msra.mxu1 %v2048_v21  ;;  %472 = vmatprep.subr.mxu0 %v2052_v22 }
  0x3e   :  { %73 = vperm.xlu0 %1722, %v38_v62   ;;  %543 = vmatprep.subr.mxu1 %v2054_v23  ;;  %v3061_v62 = vld [vmem:[#allocation26_spill] sm:$0xff] }
  0x3f   :  { %473 = vmatpush1.msra.mxu0 %v2058_v24  ;;  %544 = vmatpush1.msra.mxu1 %v2060_v25 }
  0x40   :  { %474 = vmatprep.subr.mxu0 %v2064_v26  ;;  %545 = vmatprep.subr.mxu1 %v2066_v27 }
  0x41   :  { %475 = vmatpush1.msra.mxu0 %v2070_v28  ;;  %546 = vmatpush1.msra.mxu1 %v2072_v29 }
  0x42   :  { %476 = vmatprep.subr.mxu0 %v2076_v30  ;;  %547 = vmatprep.subr.mxu1 %v2078_v31 }
  0x43   :  { %477 = vmatpush1.msra.mxu0 %v2082_v32  ;;  %548 = vmatpush1.msra.mxu1 %v2084_v33 }
  0x44   :  { %478 = vmatprep.subr.mxu0 %v2088_v34  ;;  %549 = vmatprep.subr.mxu1 %v2090_v35 }
  0x45   :  { %479 = vmatpush1.msra.mxu0 %v2094_v36  ;;  %550 = vmatpush1.msra.mxu1 %v2096_v37 }
  0x46   :  { %480 = vmatprep.subr.mxu0 %v2100_v38  ;;  %551 = vmatprep.subr.mxu1 %v2102_v39 }
  0x47   :  { %481 = vmatpush1.msra.mxu0 %v2106_v40  ;;  %552 = vmatpush1.msra.mxu1 %v2108_v41 }
  0x48   :  { %482 = vmatprep.subr.mxu0 %v2112_v42  ;;  %553 = vmatprep.subr.mxu1 %v2114_v43 }
  0x49   :  { %483 = vmatpush1.msra.mxu0 %v2118_v44  ;;  %554 = vmatpush1.msra.mxu1 %v2120_v45 }
  0x4a   :  { %484 = vmatprep.subr.mxu0 %v2124_v46  ;;  %555 = vmatprep.subr.mxu1 %v2126_v47 }
  0x4b   :  { %485 = vmatpush1.msra.mxu0 %v2130_v48  ;;  %556 = vmatpush1.msra.mxu1 %v2132_v49 }
  0x4c   :  { %486 = vmatprep.subr.mxu0 %v2136_v50  ;;  %557 = vmatprep.subr.mxu1 %v2138_v51  ;;  %v3062_v51 = vld [vmem:[#allocation29_spill] sm:$0xff] }
  0x4d   :  { %487 = vmatpush1.msra.mxu0 %v2142_v52  ;;  %558 = vmatpush1.msra.mxu1 %v2144_v53 }
  0x4e   :  { %488 = vmatprep.subr.mxu0 %v2148_v54  ;;  %559 = vmatprep.subr.mxu1 %v2150_v55 }
  0x4f   :  { %489 = vmatpush1.msra.mxu0 %v2154_v56  ;;  %560 = vmatpush1.msra.mxu1 %v3060_v57 }
  0x50   :  { %490 = vmatprep.subr.mxu0 %v2160_v58  ;;  %561 = vmatprep.subr.mxu1 %v3061_v62  ;;  %v82_v62 = vlaneseq }
  0x51   :  { %491 = vmatpush1.msra.mxu0 %v2166_v60  ;;  %562 = vmatpush1.msra.mxu1 %v2168_v61 }
  0x52   :  { %492 = vmatprep.subr.mxu0 %v3062_v51  ;;  %563 = vmatprep.subr.mxu1 %v2174_v63  ;;  %v83_v60 = vshrl.u32 %v82_v62, 7  ;;  %v40_v51 = vld [vmem:[%s2918_s1] sm:$0xf] }
  0x53   :  { %493 = vmatpush1.msra.mxu0 %v2178_v1  ;;  %526 = vmatprep.mubr.f32.mxu0 %v3059_v59 }
  0x54   :  { %564 = vmatpush1.msra.mxu1 %v2180_v0  ;;  %597 = vmatprep.mubr.f32.mxu1 %v3059_v59  ;;  %v84_v58 = vsub.s32 0, %v83_v60  ;;  %v88_v63 = vsub.s32 1, %v83_v60  ;;  %v134_v0 = vld [vmem:[%s2920_s3] sm:$0xf]  ;;  %v96_v56 = vsub.s32 3, %v83_v60  ;;  %v92_v49 = vsub.s32 2, %v83_v60 }
  0x55   :  { %636 = vmatprep.subr.mxu0 %v1996_v2  ;;  %707 = vmatprep.subr.mxu1 %v1998_v3 }
  0x56   :  { %v2273_v61 = vrot.slane %v40_v51, %v84_v58  ;;  %v2278_v1 = vrot.slane %v40_v51, %v88_v63  ;;  %v2281_v3 = vrot.slane %v134_v0, %v84_v58  ;;  %v2284_v57 = vrot.slane %v134_v0, %v88_v63 }
  0x57   :  { %v2288_v53 = vrot.slane %v40_v51, %v96_v56  ;;  %v2293_v45 = vrot.slane %v40_v51, %v92_v49 }
  0x58   :  { %3063 = vst [vmem:[#allocation33_spill] sm:$0xff] %v2273_v61  ;;  %3064 = vst [vmem:[#allocation34_spill] sm:$0xff] %v2278_v1 }
  0x59   :  { %3065 = vst [vmem:[#allocation35_spill] sm:$0xff] %v2284_v57 }
  0xad   :  { %v44_v59 = vpop.permute.xlu0 %43 }
  0xae   :  { %v102_v2 = vmul.f32 %v2273_v61, %v44_v59  ;;  %v103_v62 = vmul.f32 %v2278_v1, %v44_v59  ;;  %v105_v58 = vmul.f32 %v2288_v53, %v44_v59  ;;  %v2291_v61 = vrot.slane %v134_v0, %v96_v56 }
  0xb0   :  { %v156_v55 = vadd.f32 %v2281_v3, %v102_v2  ;;  %v157_v54 = vadd.f32 %v2284_v57, %v103_v62  ;;  %3066 = vst [vmem:[#allocation36_spill] sm:$0xff] %v2291_v61  ;;  %v159_v2 = vadd.f32 %v2291_v61, %v105_v58  ;;  %v104_v57 = vmul.f32 %v2293_v45, %v44_v59 }
  0xf1   :  { %v354_v52 = vpop.f32.mrf.mxu0  ;;  %v425_v63 = vpop.f32.mrf.mxu1 }
  0xf2   :  { %v430_v50 = vadd.f32 %v354_v52, %v156_v55  ;;  %v2297_v52 = vrot.slane %v134_v0, %v92_v49 }
  0xf3   :  { %v356_v48 = vpop.f32.mrf.mxu0  ;;  %v427_v62 = vpop.f32.mrf.mxu1 }
  0xf4   :  { %v1692_v47 = vmul.f32 -1.442695, %v430_v50  ;;  %v431_v46 = vadd.f32 %v356_v48, %v157_v54  ;;  %v433_v55 = vadd.f32 %v427_v62, %v159_v2  ;;  %v158_v48 = vadd.f32 %v2297_v52, %v104_v57 }
  0xf6   :  { %1724 = vpow2.f32 %v1692_v47  ;;  %v1693_v1 = vmul.f32 -1.442695, %v431_v46  ;;  %v1694_v50 = vmul.f32 -1.442695, %v433_v55  ;;  %v432_v56 = vadd.f32 %v425_v63, %v158_v48  ;;  %v3068_v55 = vld [vmem:[#allocation13_spill] sm:$0xff]  ;;  %v3069_v48 = vld [vmem:[#allocation14_spill] sm:$0xff] }
  0xf8   :  { %1726 = vpow2.f32 %v1693_v1 }
  0xf9   :  { %1728 = vpow2.f32 %v1694_v50  ;;  %v3070_v50 = vld [vmem:[#allocation15_spill] sm:$0xff] }
 0x103   :  { %v1725_v54 = vpop.eup %1724 }
 0x104   :  { %v437_v60 = vadd.f32 1.0, %v1725_v54  ;;  %v3071_v54 = vld [vmem:[#allocation16_spill] sm:$0xff] }
 0x105   :  { %v1727_v47 = vpop.eup %1726 }
 0x106   :  { %1730 = vrcp.f32 %v437_v60  ;;  %v443_v46 = vadd.f32 1.0, %v1727_v47  ;;  %v1729_v51 = vpop.eup %1728  ;;  %v3073_v60 = vld [vmem:[#allocation18_spill] sm:$0xff]  ;;  %v3074_v47 = vld [vmem:[#allocation19_spill] sm:$0xff] }
 0x107   :  { %1732 = vtanh.f32 %v432_v56  ;;  %v450_v59 = vadd.f32 1.0, %v1729_v51  ;;  %v3072_v56 = vld [vmem:[#allocation17_spill] sm:$0xff] }
 0x108   :  { %1734 = vrcp.f32 %v443_v46  ;;  %v3075_v46 = vld [vmem:[#allocation20_spill] sm:$0xff]  ;;  %v3076_v51 = vld [vmem:[#allocation21_spill] sm:$0xff] }
 0x109   :  { %1736 = vrcp.f32 %v450_v59  ;;  %v3079_v59 = vld [vmem:[#allocation24_spill] sm:$0xff] }
 0x113   :  { %v1731_v1 = vpop.eup %1730 }
 0x114   :  { %v1733_v58 = vpop.eup %1732 }
 0x115   :  { %v1735_v61 = vpop.eup %1734  ;;  %v454_v49 = vmul.f32 %v1733_v58, %v1731_v1  ;;  %v3077_v1 = vld [vmem:[#allocation22_spill] sm:$0xff]  ;;  %v3078_v58 = vld [vmem:[#allocation23_spill] sm:$0xff] }
 0x116   :  { %v453_v0 = vmul.f32 0.0, %v1735_v61  ;;  %v1737_v57 = vpop.eup %1736  ;;  %v3067_v61 = vld [vmem:[#allocation12_spill] sm:$0xff] }
 0x118   :  { %v2300_v2 = vadd.f32 %v454_v49, %v453_v0  ;;  %v3080_v0 = vld [vmem:[#allocation25_spill] sm:$0xff]  ;;  %v3081_v49 = vld [vmem:[#allocation26_spill] sm:$0xff] }
 0x11a   :  { %1738 = vtanh.f32 %v2300_v2 }
 0x127   :  { %v1739_v63 = vpop.eup %1738 }
 0x128   :  { %v457_v62 = vmul.f32 %v1739_v63, %v1737_v57  ;;  %v3082_v57 = vld [vmem:[#allocation27_spill] sm:$0xff]  ;;  %v3083_v63 = vld [vmem:[#allocation28_spill] sm:$0xff] }
 0x12a   :  { %527 = vmatmul.mubr.f32.vlgmr.msra.gmra.mxu0 %v457_v62  ;;  %598 = vmatmul.mubr.f32.vlgmr.msra.gmra.mxu1 %v457_v62  ;;  %v3084_v62 = vld [vmem:[#allocation29_spill] sm:$0xff] }
 0x12b   :  { %637 = vmatpush1.msra.mxu0 %v2000_v4  ;;  %708 = vmatpush1.msra.mxu1 %v2004_v5 }
 0x12c   :  { %638 = vmatprep.subr.mxu0 %v2006_v6  ;;  %709 = vmatprep.subr.mxu1 %v2008_v7 }
 0x12d   :  { %639 = vmatpush1.msra.mxu0 %v2012_v8  ;;  %710 = vmatpush1.msra.mxu1 %v2014_v9 }
 0x12e   :  { %640 = vmatprep.subr.mxu0 %v2016_v10  ;;  %711 = vmatprep.subr.mxu1 %v2020_v11 }
 0x12f   :  { %641 = vmatpush1.msra.mxu0 %v2022_v12  ;;  %712 = vmatpush1.msra.mxu1 %v2024_v13 }
 0x130   :  { %642 = vmatprep.subr.mxu0 %v2028_v14  ;;  %713 = vmatprep.subr.mxu1 %v2030_v15 }
 0x131   :  { %643 = vmatpush1.msra.mxu0 %v2034_v16  ;;  %714 = vmatpush1.msra.mxu1 %v2036_v17 }
 0x132   :  { %644 = vmatprep.subr.mxu0 %v2040_v18  ;;  %715 = vmatprep.subr.mxu1 %v2042_v19 }
 0x133   :  { %645 = vmatpush1.msra.mxu0 %v2046_v20  ;;  %716 = vmatpush1.msra.mxu1 %v2048_v21 }
 0x134   :  { %646 = vmatprep.subr.mxu0 %v2052_v22  ;;  %717 = vmatprep.subr.mxu1 %v2054_v23 }
 0x135   :  { %647 = vmatpush1.msra.mxu0 %v2058_v24  ;;  %718 = vmatpush1.msra.mxu1 %v2060_v25 }
 0x136   :  { %648 = vmatprep.subr.mxu0 %v2064_v26  ;;  %719 = vmatprep.subr.mxu1 %v2066_v27 }
 0x137   :  { %649 = vmatpush1.msra.mxu0 %v2070_v28  ;;  %720 = vmatpush1.msra.mxu1 %v2072_v29 }
 0x138   :  { %650 = vmatprep.subr.mxu0 %v2076_v30  ;;  %721 = vmatprep.subr.mxu1 %v2078_v31 }
 0x139   :  { %651 = vmatpush1.msra.mxu0 %v2082_v32  ;;  %722 = vmatpush1.msra.mxu1 %v2084_v33 }
 0x13a   :  { %652 = vmatprep.subr.mxu0 %v2088_v34  ;;  %723 = vmatprep.subr.mxu1 %v2090_v35 }
 0x13b   :  { %653 = vmatpush1.msra.mxu0 %v2094_v36  ;;  %724 = vmatpush1.msra.mxu1 %v2096_v37 }
 0x13c   :  { %654 = vmatprep.subr.mxu0 %v2100_v38  ;;  %725 = vmatprep.subr.mxu1 %v2102_v39 }
 0x13d   :  { %655 = vmatpush1.msra.mxu0 %v2106_v40  ;;  %726 = vmatpush1.msra.mxu1 %v2108_v41 }
 0x13e   :  { %656 = vmatprep.subr.mxu0 %v2112_v42  ;;  %727 = vmatprep.subr.mxu1 %v2114_v43 }
 0x13f   :  { %657 = vmatpush1.msra.mxu0 %v2118_v44  ;;  %728 = vmatpush1.msra.mxu1 %v3067_v61  ;;  %v3094_v61 = vld [vmem:[#allocation36_spill] sm:$0xff] }
 0x140   :  { %658 = vmatprep.subr.mxu0 %v3068_v55  ;;  %729 = vmatprep.subr.mxu1 %v3069_v48 }
 0x141   :  { %659 = vmatpush1.msra.mxu0 %v3070_v50  ;;  %730 = vmatpush1.msra.mxu1 %v3071_v54 }
 0x142   :  { %660 = vmatprep.subr.mxu0 %v3072_v56  ;;  %731 = vmatprep.subr.mxu1 %v3073_v60 }
 0x143   :  { %661 = vmatpush1.msra.mxu0 %v3074_v47  ;;  %732 = vmatpush1.msra.mxu1 %v3075_v46  ;;  %v3085_v47 = vld [vmem:[#allocation30_spill] sm:$0xff]  ;;  %v3086_v46 = vld [vmem:[#allocation31_spill] sm:$0xff] }
 0x144   :  { %662 = vmatprep.subr.mxu0 %v3076_v51  ;;  %733 = vmatprep.subr.mxu1 %v3077_v1  ;;  %v3087_v51 = vmov 0.0   ;;  %v3088_v1 = vld [vmem:[#allocation32_spill] sm:$0xff] }
 0x145   :  { %663 = vmatpush1.msra.mxu0 %v3078_v58  ;;  %734 = vmatpush1.msra.mxu1 %v3079_v59  ;;  %v3089_v59 = vld [vmem:[#allocation9_spill] sm:$0xff] }
 0x146   :  { %664 = vmatprep.subr.mxu0 %v3080_v0  ;;  %735 = vmatprep.subr.mxu1 %v3081_v49  ;;  %v3090_v0 = vld [vmem:[#allocation10_spill] sm:$0xff] }
 0x147   :  { %665 = vmatpush1.msra.mxu0 %v3082_v57  ;;  %736 = vmatpush1.msra.mxu1 %v3083_v63  ;;  %v34_v63 = vld [vmem:[%s2917_s0 + $0x10] sm:$0xff] }
 0x148   :  { %666 = vmatprep.subr.mxu0 %v3084_v62  ;;  %737 = vmatprep.subr.mxu1 %v3085_v47  ;;  %v35_v47 = vld [vmem:[%s2917_s0 + $0x18] sm:$0xff]  ;;  %v3092_v62 = vld [vmem:[#allocation34_spill] sm:$0xff] }
 0x149   :  { %667 = vmatpush1.msra.mxu0 %v3086_v46  ;;  %700 = vmatprep.mubr.f32.mxu0 %v3087_v51 }
 0x14a   :  { %738 = vmatpush1.msra.mxu1 %v3088_v1  ;;  %771 = vmatprep.mubr.f32.mxu1 %v3087_v51  ;;  %v37_v1 = vld [vmem:[%s2917_s0 + $0x28] sm:$0xff] }
 0x14b   :  { %810 = vmatprep.subr.mxu0 %v3089_v59  ;;  %881 = vmatprep.subr.mxu1 %v3090_v0  ;;  %v39_v59 = vld [vmem:[%s2917_s0 + $0x38] sm:$0xff]  ;;  %v49_v0 = vpop.permute.xlu0 %48  ;;  %v3091_v51 = vld [vmem:[#allocation33_spill] sm:$0xff]  ;;  %s1965_s0 = smov [#allocation6]  }
 0x14c   :  { %53 = vperm.xlu1 %1723, %v34_v63   ;;  %v106_v46 = vmul.f32 %v3091_v51, %v49_v0  ;;  %v107_v63 = vmul.f32 %v3092_v62, %v49_v0  ;;  %v109_v55 = vmul.f32 %v2288_v53, %v49_v0  ;;  %v108_v62 = vmul.f32 %v2293_v45, %v49_v0  ;;  %s1683_s13 = sshll.u32 %s1965_s0, 4  ;;  %s1684_s13 = int_to_ptr.vmem [resolvable:$true] %s1683_s13 }
 0x14d   :  { %s1936_s14 = scalar_lea.vmem %s1684_s13, 128  ;;  %p1941_p6 = scmp.lt.s32.totalorder %s1684_s13, %s1684_s13 }
 0x14e   :  { %v160_v57 = vadd.f32 %v2281_v3, %v106_v46  ;;  %v163_v51 = vadd.f32 %v3094_v61, %v109_v55  ;;  %v162_v46 = vadd.f32 %v2297_v52, %v108_v62  ;;  %p1937_p5 = scmp.ne.s32.totalorder %s1684_s13, %s1936_s14  ;;  %p1942_p7 = scmp.lt.s32.totalorder %s1936_s14, %s1936_s14 }
 0x150   :  { %58 = vperm.xlu1 %1723, %v35_v47   ;;  %v3093_v47 = vld [vmem:[#allocation35_spill] sm:$0xff]  ;;  %p1943_p8 = por %p1942_p7, %p1941_p6 }
 0x151   :  { %v161_v60 = vadd.f32 %v3093_v47, %v107_v63 }
 0x152   :  { %p1944_p9 = pnand %p1943_p8, %p1937_p5 }
 0x154   :  { %68 = vperm.xlu1 %1723, %v37_v1  }
 0x158   :  { %78 = vperm.xlu1 %1723, %v39_v59  }
 0x1ea   :  { %v528_v49 = vpop.f32.mrf.mxu0  ;;  %v599_v1 = vpop.f32.mrf.mxu1 }
 0x1eb   :  { %v604_v58 = vadd.f32 %v528_v49, %v160_v57  ;;  %v606_v63 = vadd.f32 %v599_v1, %v162_v46  ;;  %v3099_v46 = vld [vmem:[#allocation15_spill] sm:$0xff] }
 0x1ec   :  { %v530_v56 = vpop.f32.mrf.mxu0  ;;  %v601_v59 = vpop.f32.mrf.mxu1 }
 0x1ed   :  { %v1695_v54 = vmul.f32 -1.442695, %v604_v58  ;;  %v605_v50 = vadd.f32 %v530_v56, %v161_v60  ;;  %v607_v44 = vadd.f32 %v601_v59, %v163_v51  ;;  %v3098_v59 = vld [vmem:[#allocation14_spill] sm:$0xff] }
 0x1ef   :  { %1740 = vpow2.f32 %v1695_v54  ;;  %v1696_v48 = vmul.f32 -1.442695, %v605_v50  ;;  %v1697_v49 = vmul.f32 -1.442695, %v607_v44 }
 0x1f1   :  { %1742 = vpow2.f32 %v1696_v48 }
 0x1f2   :  { %1744 = vpow2.f32 %v1697_v49  ;;  %v3100_v49 = vld [vmem:[#allocation16_spill] sm:$0xff] }
 0x1fc   :  { %v1741_v57 = vpop.eup %1740 }
 0x1fd   :  { %v611_v47 = vadd.f32 1.0, %v1741_v57  ;;  %v3101_v57 = vld [vmem:[#allocation17_spill] sm:$0xff] }
 0x1fe   :  { %v1743_v58 = vpop.eup %1742 }
 0x1ff   :  { %1746 = vrcp.f32 %v611_v47  ;;  %v617_v54 = vadd.f32 1.0, %v1743_v58  ;;  %v1745_v50 = vpop.eup %1744  ;;  %v3097_v47 = vld [vmem:[#allocation13_spill] sm:$0xff]  ;;  %v3103_v58 = vld [vmem:[#allocation19_spill] sm:$0xff] }
 0x200   :  { %1748 = vtanh.f32 %v606_v63  ;;  %v624_v55 = vadd.f32 1.0, %v1745_v50  ;;  %v3102_v63 = vld [vmem:[#allocation18_spill] sm:$0xff]  ;;  %v3105_v50 = vld [vmem:[#allocation21_spill] sm:$0xff] }
 0x201   :  { %1750 = vrcp.f32 %v617_v54  ;;  %v3104_v54 = vld [vmem:[#allocation20_spill] sm:$0xff] }
 0x202   :  { %1752 = vrcp.f32 %v624_v55  ;;  %v3109_v55 = vld [vmem:[#allocation25_spill] sm:$0xff] }
 0x20c   :  { %v1747_v48 = vpop.eup %1746 }
 0x20d   :  { %v1749_v56 = vpop.eup %1748 }
 0x20e   :  { %v1751_v60 = vpop.eup %1750  ;;  %v628_v61 = vmul.f32 %v1749_v56, %v1747_v48  ;;  %v3106_v48 = vld [vmem:[#allocation22_spill] sm:$0xff]  ;;  %v3107_v56 = vld [vmem:[#allocation23_spill] sm:$0xff] }
 0x20f   :  { %v627_v51 = vmul.f32 %v1751_v60, %v2300_v2  ;;  %v1753_v44 = vpop.eup %1752  ;;  %v3095_v2 = vld [vmem:[#allocation11_spill] sm:$0xff]  ;;  %v3108_v60 = vld [vmem:[#allocation24_spill] sm:$0xff] }
 0x211   :  { %v2390_v0 = vadd.f32 %v628_v61, %v627_v51  ;;  %v3096_v61 = vld [vmem:[#allocation12_spill] sm:$0xff]  ;;  %v3110_v51 = vld [vmem:[#allocation26_spill] sm:$0xff] }
 0x213   :  { %1754 = vtanh.f32 %v2390_v0 }
 0x220   :  { %v1755_v62 = vpop.eup %1754 }
 0x221   :  { %v631_v1 = vmul.f32 %v1755_v62, %v1753_v44  ;;  %v3111_v44 = vld [vmem:[#allocation27_spill] sm:$0xff]  ;;  %v3112_v62 = vld [vmem:[#allocation28_spill] sm:$0xff] }
 0x223   :  { %701 = vmatmul.mubr.f32.vlgmr.msra.gmra.mxu0 %v631_v1  ;;  %772 = vmatmul.mubr.f32.vlgmr.msra.gmra.mxu1 %v631_v1  ;;  %v3113_v1 = vld [vmem:[#allocation29_spill] sm:$0xff] }
 0x224   :  { %811 = vmatpush1.msra.mxu0 %v2000_v4  ;;  %882 = vmatpush1.msra.mxu1 %v2004_v5 }
 0x225   :  { %812 = vmatprep.subr.mxu0 %v2006_v6  ;;  %883 = vmatprep.subr.mxu1 %v2008_v7 }
 0x226   :  { %813 = vmatpush1.msra.mxu0 %v2012_v8  ;;  %884 = vmatpush1.msra.mxu1 %v2014_v9 }
 0x227   :  { %814 = vmatprep.subr.mxu0 %v2016_v10  ;;  %885 = vmatprep.subr.mxu1 %v2020_v11 }
 0x228   :  { %815 = vmatpush1.msra.mxu0 %v2022_v12  ;;  %886 = vmatpush1.msra.mxu1 %v2024_v13 }
 0x229   :  { %816 = vmatprep.subr.mxu0 %v2028_v14  ;;  %887 = vmatprep.subr.mxu1 %v2030_v15 }
 0x22a   :  { %817 = vmatpush1.msra.mxu0 %v2034_v16  ;;  %888 = vmatpush1.msra.mxu1 %v2036_v17 }
 0x22b   :  { %818 = vmatprep.subr.mxu0 %v2040_v18  ;;  %889 = vmatprep.subr.mxu1 %v2042_v19 }
 0x22c   :  { %819 = vmatpush1.msra.mxu0 %v2046_v20  ;;  %890 = vmatpush1.msra.mxu1 %v2048_v21 }
 0x22d   :  { %820 = vmatprep.subr.mxu0 %v2052_v22  ;;  %891 = vmatprep.subr.mxu1 %v2054_v23 }
 0x22e   :  { %821 = vmatpush1.msra.mxu0 %v2058_v24  ;;  %892 = vmatpush1.msra.mxu1 %v2060_v25 }
 0x22f   :  { %822 = vmatprep.subr.mxu0 %v2064_v26  ;;  %893 = vmatprep.subr.mxu1 %v2066_v27 }
 0x230   :  { %823 = vmatpush1.msra.mxu0 %v2070_v28  ;;  %894 = vmatpush1.msra.mxu1 %v2072_v29 }
 0x231   :  { %824 = vmatprep.subr.mxu0 %v2076_v30  ;;  %895 = vmatprep.subr.mxu1 %v2078_v31 }
 0x232   :  { %825 = vmatpush1.msra.mxu0 %v2082_v32  ;;  %896 = vmatpush1.msra.mxu1 %v2084_v33 }
 0x233   :  { %826 = vmatprep.subr.mxu0 %v2088_v34  ;;  %897 = vmatprep.subr.mxu1 %v2090_v35 }
 0x234   :  { %827 = vmatpush1.msra.mxu0 %v2094_v36  ;;  %898 = vmatpush1.msra.mxu1 %v2096_v37 }
 0x235   :  { %828 = vmatprep.subr.mxu0 %v2100_v38  ;;  %899 = vmatprep.subr.mxu1 %v2102_v39 }
 0x236   :  { %829 = vmatpush1.msra.mxu0 %v2106_v40  ;;  %900 = vmatpush1.msra.mxu1 %v2108_v41 }
 0x237   :  { %830 = vmatprep.subr.mxu0 %v2112_v42  ;;  %901 = vmatprep.subr.mxu1 %v2114_v43 }
 0x238   :  { %831 = vmatpush1.msra.mxu0 %v3095_v2  ;;  %902 = vmatpush1.msra.mxu1 %v3096_v61 }
 0x239   :  { %832 = vmatprep.subr.mxu0 %v3097_v47  ;;  %903 = vmatprep.subr.mxu1 %v3098_v59 }
 0x23a   :  { %833 = vmatpush1.msra.mxu0 %v3099_v46  ;;  %904 = vmatpush1.msra.mxu1 %v3100_v49 }
 0x23b   :  { %834 = vmatprep.subr.mxu0 %v3101_v57  ;;  %905 = vmatprep.subr.mxu1 %v3102_v63 }
 0x23c   :  { %835 = vmatpush1.msra.mxu0 %v3103_v58  ;;  %906 = vmatpush1.msra.mxu1 %v3104_v54  ;;  %v3114_v58 = vld [vmem:[#allocation30_spill] sm:$0xff]  ;;  %v3115_v54 = vld [vmem:[#allocation31_spill] sm:$0xff] }
 0x23d   :  { %836 = vmatprep.subr.mxu0 %v3105_v50  ;;  %907 = vmatprep.subr.mxu1 %v3106_v48  ;;  %v3116_v50 = vmov 0.0   ;;  %v3117_v48 = vld [vmem:[#allocation32_spill] sm:$0xff] }
 0x23e   :  { %837 = vmatpush1.msra.mxu0 %v3107_v56  ;;  %908 = vmatpush1.msra.mxu1 %v3108_v60  ;;  %v3118_v60 = vld [vmem:[#allocation9_spill] sm:$0xff] }
 0x23f   :  { %838 = vmatprep.subr.mxu0 %v3109_v55  ;;  %909 = vmatprep.subr.mxu1 %v3110_v51  ;;  %v3119_v55 = vld [vmem:[#allocation10_spill] sm:$0xff]  ;;  %v54_v51 = vpop.permute.xlu1 %53 }
 0x240   :  { %839 = vmatpush1.msra.mxu0 %v3111_v44  ;;  %910 = vmatpush1.msra.mxu1 %v3112_v62  ;;  %v3120_v44 = vld [vmem:[#allocation33_spill] sm:$0xff]  ;;  %v3121_v62 = vld [vmem:[#allocation34_spill] sm:$0xff] }
 0x241   :  { %840 = vmatprep.subr.mxu0 %v3113_v1  ;;  %911 = vmatprep.subr.mxu1 %v3114_v58  ;;  %v110_v56 = vmul.f32 %v3120_v44, %v54_v51  ;;  %v111_v63 = vmul.f32 %v3121_v62, %v54_v51  ;;  %v3122_v58 = vld [vmem:[#allocation35_spill] sm:$0xff]  ;;  %v112_v62 = vmul.f32 %v2293_v45, %v54_v51 }
 0x242   :  { %841 = vmatpush1.msra.mxu0 %v3115_v54  ;;  %874 = vmatprep.mubr.f32.mxu0 %v3116_v50 }
 0x243   :  { %912 = vmatpush1.msra.mxu1 %v3117_v48  ;;  %945 = vmatprep.mubr.f32.mxu1 %v3116_v50  ;;  %v164_v1 = vadd.f32 %v2281_v3, %v110_v56  ;;  %v165_v57 = vadd.f32 %v3122_v58, %v111_v63  ;;  %v113_v50 = vmul.f32 %v2288_v53, %v54_v51 }
 0x244   :  { %984 = vmatprep.subr.mxu0 %v3118_v60  ;;  %1055 = vmatprep.subr.mxu1 %v3119_v55  ;;  %v3123_v55 = vld [vmem:[#allocation36_spill] sm:$0xff]  ;;  %v166_v56 = vadd.f32 %v2297_v52, %v112_v62 }
 0x245   :  { %v167_v61 = vadd.f32 %v3123_v55, %v113_v50 }
 0x2e3   :  { %v702_v54 = vpop.f32.mrf.mxu0  ;;  %v773_v60 = vpop.f32.mrf.mxu1 }
 0x2e4   :  { %v778_v49 = vadd.f32 %v702_v54, %v164_v1  ;;  %v780_v54 = vadd.f32 %v773_v60, %v166_v56  ;;  %v3152_v60 = vld [vmem:[#allocation36_spill] sm:$0xff] }
 0x2e5   :  { %v704_v46 = vpop.f32.mrf.mxu0  ;;  %v775_v44 = vpop.f32.mrf.mxu1 }
 0x2e6   :  { %v1698_v59 = vmul.f32 -1.442695, %v778_v49  ;;  %v779_v48 = vadd.f32 %v704_v46, %v165_v57  ;;  %v781_v2 = vadd.f32 %v775_v44, %v167_v61 }
 0x2e8   :  { %1756 = vpow2.f32 %v1698_v59  ;;  %v1699_v47 = vmul.f32 -1.442695, %v779_v48  ;;  %v1700_v63 = vmul.f32 -1.442695, %v781_v2 }
 0x2ea   :  { %1758 = vpow2.f32 %v1699_v47 }
 0x2eb   :  { %1760 = vpow2.f32 %v1700_v63 }
 0x2f5   :  { %v1757_v58 = vpop.eup %1756 }
 0x2f6   :  { %v785_v1 = vadd.f32 1.0, %v1757_v58 }
 0x2f7   :  { %v1759_v49 = vpop.eup %1758 }
 0x2f8   :  { %1762 = vrcp.f32 %v785_v1  ;;  %v791_v46 = vadd.f32 1.0, %v1759_v49  ;;  %v1761_v59 = vpop.eup %1760 }
 0x2f9   :  { %1764 = vtanh.f32 %v780_v54  ;;  %v798_v48 = vadd.f32 1.0, %v1761_v59 }
 0x2fa   :  { %1766 = vrcp.f32 %v791_v46 }
 0x2fb   :  { %1768 = vrcp.f32 %v798_v48 }
 0x305   :  { %v1763_v47 = vpop.eup %1762 }
 0x306   :  { %v1765_v57 = vpop.eup %1764 }
 0x307   :  { %v1767_v50 = vpop.eup %1766  ;;  %v802_v55 = vmul.f32 %v1765_v57, %v1763_v47 }
 0x308   :  { %v801_v61 = vmul.f32 %v1767_v50, %v2390_v0  ;;  %v1769_v2 = vpop.eup %1768 }
 0x30a   :  { %v2468_v51 = vadd.f32 %v802_v55, %v801_v61 }
 0x30c   :  { %1770 = vtanh.f32 %v2468_v51 }
 0x319   :  { %v1771_v58 = vpop.eup %1770 }
 0x31a   :  { %v805_v44 = vmul.f32 %v1771_v58, %v1769_v2 }
 0x31c   :  { %875 = vmatmul.mubr.f32.vlgmr.msra.gmra.mxu0 %v805_v44  ;;  %946 = vmatmul.mubr.f32.vlgmr.msra.gmra.mxu1 %v805_v44 }
 0x31d   :  { %985 = vmatpush1.msra.mxu0 %v2000_v4  ;;  %1056 = vmatpush1.msra.mxu1 %v2004_v5  ;;  %v3124_v4 = vld [vmem:[#allocation11_spill] sm:$0xff]  ;;  %v3125_v5 = vld [vmem:[#allocation12_spill] sm:$0xff] }
 0x31e   :  { %986 = vmatprep.subr.mxu0 %v2006_v6  ;;  %1057 = vmatprep.subr.mxu1 %v2008_v7  ;;  %v3126_v6 = vld [vmem:[#allocation13_spill] sm:$0xff]  ;;  %v3127_v7 = vld [vmem:[#allocation14_spill] sm:$0xff] }
 0x31f   :  { %987 = vmatpush1.msra.mxu0 %v2012_v8  ;;  %1058 = vmatpush1.msra.mxu1 %v2014_v9  ;;  %v3128_v8 = vld [vmem:[#allocation15_spill] sm:$0xff]  ;;  %v3129_v9 = vld [vmem:[#allocation16_spill] sm:$0xff] }
 0x320   :  { %988 = vmatprep.subr.mxu0 %v2016_v10  ;;  %1059 = vmatprep.subr.mxu1 %v2020_v11  ;;  %v3130_v10 = vld [vmem:[#allocation17_spill] sm:$0xff]  ;;  %v3131_v11 = vld [vmem:[#allocation18_spill] sm:$0xff] }
 0x321   :  { %989 = vmatpush1.msra.mxu0 %v2022_v12  ;;  %1060 = vmatpush1.msra.mxu1 %v2024_v13  ;;  %v3132_v12 = vld [vmem:[#allocation19_spill] sm:$0xff]  ;;  %v3133_v13 = vld [vmem:[#allocation20_spill] sm:$0xff] }
 0x322   :  { %990 = vmatprep.subr.mxu0 %v2028_v14  ;;  %1061 = vmatprep.subr.mxu1 %v2030_v15  ;;  %v3134_v14 = vld [vmem:[#allocation21_spill] sm:$0xff]  ;;  %v3135_v15 = vld [vmem:[#allocation22_spill] sm:$0xff] }
 0x323   :  { %991 = vmatpush1.msra.mxu0 %v2034_v16  ;;  %1062 = vmatpush1.msra.mxu1 %v2036_v17  ;;  %v3136_v16 = vld [vmem:[#allocation23_spill] sm:$0xff]  ;;  %v3137_v17 = vld [vmem:[#allocation24_spill] sm:$0xff] }
 0x324   :  { %992 = vmatprep.subr.mxu0 %v2040_v18  ;;  %1063 = vmatprep.subr.mxu1 %v2042_v19  ;;  %v3138_v18 = vld [vmem:[#allocation25_spill] sm:$0xff]  ;;  %v3139_v19 = vld [vmem:[#allocation26_spill] sm:$0xff] }
 0x325   :  { %993 = vmatpush1.msra.mxu0 %v2046_v20  ;;  %1064 = vmatpush1.msra.mxu1 %v2048_v21  ;;  %v3140_v20 = vld [vmem:[#allocation27_spill] sm:$0xff]  ;;  %v3141_v21 = vld [vmem:[#allocation28_spill] sm:$0xff] }
 0x326   :  { %994 = vmatprep.subr.mxu0 %v2052_v22  ;;  %1065 = vmatprep.subr.mxu1 %v2054_v23  ;;  %v3142_v22 = vld [vmem:[#allocation29_spill] sm:$0xff]  ;;  %v3143_v23 = vld [vmem:[#allocation30_spill] sm:$0xff] }
 0x327   :  { %995 = vmatpush1.msra.mxu0 %v2058_v24  ;;  %1066 = vmatpush1.msra.mxu1 %v2060_v25  ;;  %v3144_v24 = vld [vmem:[#allocation31_spill] sm:$0xff]  ;;  %v3145_v25 = vmov 0.0  }
 0x328   :  { %996 = vmatprep.subr.mxu0 %v2064_v26  ;;  %1067 = vmatprep.subr.mxu1 %v2066_v27  ;;  %v3146_v26 = vld [vmem:[#allocation32_spill] sm:$0xff]  ;;  %v2535_v27 = vld [vmem:[#allocation3 + $0x1e8] sm:$0xff] }
 0x329   :  { %997 = vmatpush1.msra.mxu0 %v2070_v28  ;;  %1068 = vmatpush1.msra.mxu1 %v2072_v29  ;;  %3147 = vst [vmem:[#allocation9_spill] sm:$0xff] %v2535_v27  ;;  %v2538_v28 = vld [vmem:[#allocation3 + $0x1f8] sm:$0xff]  ;;  %v59_v29 = vpop.permute.xlu1 %58 }
 0x32a   :  { %998 = vmatprep.subr.mxu0 %v2076_v30  ;;  %1069 = vmatprep.subr.mxu1 %v2078_v31  ;;  %3148 = vst [vmem:[#allocation10_spill] sm:$0xff] %v2538_v28  ;;  %v3149_v30 = vld [vmem:[#allocation33_spill] sm:$0xff]  ;;  %v117_v0 = vmul.f32 %v2288_v53, %v59_v29  ;;  %v116_v56 = vmul.f32 %v2293_v45, %v59_v29 }
 0x32b   :  { %999 = vmatpush1.msra.mxu0 %v2082_v32  ;;  %1070 = vmatpush1.msra.mxu1 %v2084_v33  ;;  %v114_v31 = vmul.f32 %v3149_v30, %v59_v29  ;;  %v3150_v32 = vld [vmem:[#allocation34_spill] sm:$0xff] }
 0x32c   :  { %1000 = vmatprep.subr.mxu0 %v2088_v34  ;;  %1071 = vmatprep.subr.mxu1 %v2090_v35  ;;  %v115_v33 = vmul.f32 %v3150_v32, %v59_v29  ;;  %v171_v55 = vadd.f32 %v3152_v60, %v117_v0  ;;  %v170_v54 = vadd.f32 %v2297_v52, %v116_v56  ;;  %v2607_v29 = vld [vmem:[#allocation3 + $0x148] sm:$0xff]  ;;  %v2652_v56 = vld [vmem:[#allocation3 + $0xf0] sm:$0xff] }
 0x32d   :  { %1001 = vmatpush1.msra.mxu0 %v2094_v36  ;;  %1072 = vmatpush1.msra.mxu1 %v2096_v37  ;;  %v168_v34 = vadd.f32 %v2281_v3, %v114_v31  ;;  %v3151_v37 = vld [vmem:[#allocation35_spill] sm:$0xff]  ;;  %v2643_v0 = vld [vmem:[#allocation3 + $0xe8] sm:$0xff] }
 0x32e   :  { %1002 = vmatprep.subr.mxu0 %v2100_v38  ;;  %1073 = vmatprep.subr.mxu1 %v2102_v39  ;;  %v169_v38 = vadd.f32 %v3151_v37, %v115_v33  ;;  %v2610_v31 = vld [vmem:[#allocation3 + $0x158] sm:$0xff]  ;;  %v2613_v33 = vld [vmem:[#allocation3 + $0x140] sm:$0xff] }
 0x32f   :  { %1003 = vmatpush1.msra.mxu0 %v2106_v40  ;;  %1074 = vmatpush1.msra.mxu1 %v2108_v41 }
 0x330   :  { %1004 = vmatprep.subr.mxu0 %v2112_v42  ;;  %1075 = vmatprep.subr.mxu1 %v2114_v43 }
 0x331   :  { %1005 = vmatpush1.msra.mxu0 %v3124_v4  ;;  %1076 = vmatpush1.msra.mxu1 %v3125_v5 }
 0x332   :  { %1006 = vmatprep.subr.mxu0 %v3126_v6  ;;  %1077 = vmatprep.subr.mxu1 %v3127_v7 }
 0x333   :  { %1007 = vmatpush1.msra.mxu0 %v3128_v8  ;;  %1078 = vmatpush1.msra.mxu1 %v3129_v9  ;;  %v2553_v9 = vld [vmem:[#allocation3 + $0x1e0] sm:$0xff] }
 0x334   :  { %1008 = vmatprep.subr.mxu0 %v3130_v10  ;;  %1079 = vmatprep.subr.mxu1 %v3131_v11  ;;  %v2556_v10 = vld [vmem:[#allocation3 + $0x1f0] sm:$0xff]  ;;  %v2559_v11 = vld [vmem:[#allocation3 + $0x1c8] sm:$0xff] }
 0x335   :  { %1009 = vmatpush1.msra.mxu0 %v3132_v12  ;;  %1080 = vmatpush1.msra.mxu1 %v3133_v13  ;;  %v2565_v12 = vld [vmem:[#allocation3 + $0x1c0] sm:$0xff]  ;;  %v2568_v13 = vld [vmem:[#allocation3 + $0x1d0] sm:$0xff] }
 0x336   :  { %1010 = vmatprep.subr.mxu0 %v3134_v14  ;;  %1081 = vmatprep.subr.mxu1 %v3135_v15  ;;  %v2571_v14 = vld [vmem:[#allocation3 + $0x1a8] sm:$0xff]  ;;  %v2574_v15 = vld [vmem:[#allocation3 + $0x1b8] sm:$0xff] }
 0x337   :  { %1011 = vmatpush1.msra.mxu0 %v3136_v16  ;;  %1082 = vmatpush1.msra.mxu1 %v3137_v17  ;;  %v2577_v16 = vld [vmem:[#allocation3 + $0x1a0] sm:$0xff]  ;;  %v2580_v17 = vld [vmem:[#allocation3 + $0x1b0] sm:$0xff] }
 0x338   :  { %1012 = vmatprep.subr.mxu0 %v3138_v18  ;;  %1083 = vmatprep.subr.mxu1 %v3139_v19  ;;  %v2583_v18 = vld [vmem:[#allocation3 + $0x188] sm:$0xff]  ;;  %v2586_v19 = vld [vmem:[#allocation3 + $0x198] sm:$0xff] }
 0x339   :  { %1013 = vmatpush1.msra.mxu0 %v3140_v20  ;;  %1084 = vmatpush1.msra.mxu1 %v3141_v21  ;;  %v2589_v20 = vld [vmem:[#allocation3 + $0x180] sm:$0xff]  ;;  %v2592_v21 = vld [vmem:[#allocation3 + $0x190] sm:$0xff] }
 0x33a   :  { %1014 = vmatprep.subr.mxu0 %v3142_v22  ;;  %1085 = vmatprep.subr.mxu1 %v3143_v23  ;;  %v2595_v22 = vld [vmem:[#allocation3 + $0x168] sm:$0xff]  ;;  %v2598_v23 = vld [vmem:[#allocation3 + $0x178] sm:$0xff] }
 0x33b   :  { %1015 = vmatpush1.msra.mxu0 %v3144_v24  ;;  %1048 = vmatprep.mubr.f32.mxu0 %v3145_v25  ;;  %v2601_v24 = vld [vmem:[#allocation3 + $0x160] sm:$0xff] }
 0x33c   :  { %1086 = vmatpush1.msra.mxu1 %v3146_v26  ;;  %1119 = vmatprep.mubr.f32.mxu1 %v3145_v25  ;;  %v2604_v26 = vld [vmem:[#allocation3 + $0x170] sm:$0xff] }
 0x33d   :  { %1158 = vmatprep.subr.mxu0 %v2535_v27  ;;  %1229 = vmatprep.subr.mxu1 %v2538_v28 }
 0x3dc   :  { %v876_v35 = vpop.f32.mrf.mxu0  ;;  %v947_v42 = vpop.f32.mrf.mxu1 }
 0x3dd   :  { %v952_v36 = vadd.f32 %v876_v35, %v168_v34  ;;  %v954_v46 = vadd.f32 %v947_v42, %v170_v54  ;;  %v2616_v34 = vld [vmem:[#allocation3 + $0x150] sm:$0xff]  ;;  %v2619_v35 = vld [vmem:[#allocation3 + $0x128] sm:$0xff]  ;;  %v2637_v42 = vld [vmem:[#allocation3 + $0x100] sm:$0xff] }
 0x3de   :  { %v878_v39 = vpop.f32.mrf.mxu0  ;;  %v949_v62 = vpop.f32.mrf.mxu1  ;;  %v2658_v54 = vld [vmem:[#allocation3 + $0xd8] sm:$0xff] }
 0x3df   :  { %v1701_v40 = vmul.f32 -1.442695, %v952_v36  ;;  %v953_v41 = vadd.f32 %v878_v39, %v169_v38  ;;  %v955_v63 = vadd.f32 %v949_v62, %v171_v55  ;;  %v2622_v36 = vld [vmem:[#allocation3 + $0x138] sm:$0xff]  ;;  %v2625_v38 = vld [vmem:[#allocation3 + $0x120] sm:$0xff]  ;;  %v2628_v39 = vld [vmem:[#allocation3 + $0x130] sm:$0xff] }
 0x3e0   :  { %v2646_v62 = vld [vmem:[#allocation3 + $0xf8] sm:$0xff]  ;;  %v2649_v55 = vld [vmem:[#allocation3 + $0xe0] sm:$0xff] }
 0x3e1   :  { %1772 = vpow2.f32 %v1701_v40  ;;  %v1702_v43 = vmul.f32 -1.442695, %v953_v41  ;;  %v1703_v1 = vmul.f32 -1.442695, %v955_v63  ;;  %v2631_v40 = vld [vmem:[#allocation3 + $0x108] sm:$0xff]  ;;  %v2634_v41 = vld [vmem:[#allocation3 + $0x118] sm:$0xff] }
 0x3e2   :  { %v2655_v63 = vld [vmem:[#allocation3 + $0xc8] sm:$0xff] }
 0x3e3   :  { %1774 = vpow2.f32 %v1702_v43  ;;  %v2640_v43 = vld [vmem:[#allocation3 + $0x110] sm:$0xff] }
 0x3e4   :  { %1776 = vpow2.f32 %v1703_v1  ;;  %v2661_v1 = vld [vmem:[#allocation3 + $0xc0] sm:$0xff] }
 0x3ee   :  { %v1773_v49 = vpop.eup %1772 }
 0x3ef   :  { %v959_v59 = vadd.f32 1.0, %v1773_v49  ;;  %v2664_v49 = vld [vmem:[#allocation3 + $0xd0] sm:$0xff] }
 0x3f0   :  { %v1775_v47 = vpop.eup %1774 }
 0x3f1   :  { %1778 = vrcp.f32 %v959_v59  ;;  %v965_v57 = vadd.f32 1.0, %v1775_v47  ;;  %v1777_v50 = vpop.eup %1776  ;;  %v2670_v59 = vld [vmem:[#allocation3 + $0xb8] sm:$0xff]  ;;  %v2673_v47 = vld [vmem:[#allocation3 + $0xa0] sm:$0xff] }
 0x3f2   :  { %1780 = vtanh.f32 %v954_v46  ;;  %v972_v58 = vadd.f32 1.0, %v1777_v50  ;;  %v2667_v46 = vld [vmem:[#allocation3 + $0xa8] sm:$0xff]  ;;  %3153 = vst [vmem:[#allocation11_spill] sm:$0xff] %v2673_v47 }
 0x3f3   :  { %1782 = vrcp.f32 %v965_v57  ;;  %v2676_v57 = vld [vmem:[#allocation3 + $0xb0] sm:$0xff]  ;;  %v2679_v50 = vld [vmem:[#allocation3 + $0x88] sm:$0xff] }
 0x3f4   :  { %1784 = vrcp.f32 %v972_v58  ;;  %3154 = vst [vmem:[#allocation12_spill] sm:$0xff] %v2676_v57  ;;  %3155 = vst [vmem:[#allocation13_spill] sm:$0xff] %v2679_v50  ;;  %v2691_v58 = vld [vmem:[#allocation3 + $0x68] sm:$0xff] }
 0x3f5   :  { %3159 = vst [vmem:[#allocation17_spill] sm:$0xff] %v2691_v58 }
 0x3fe   :  { %v1779_v48 = vpop.eup %1778 }
 0x3ff   :  { %v1781_v61 = vpop.eup %1780 }
 0x400   :  { %v1783_v2 = vpop.eup %1782  ;;  %v976_v44 = vmul.f32 %v1781_v61, %v1779_v48  ;;  %v2682_v48 = vld [vmem:[#allocation3 + $0x98] sm:$0xff]  ;;  %v2685_v61 = vld [vmem:[#allocation3 + $0x80] sm:$0xff] }
 0x401   :  { %v975_v4 = vmul.f32 %v1783_v2, %v2468_v51  ;;  %v1785_v6 = vpop.eup %1784  ;;  %v2562_v51 = vld [vmem:[#allocation3 + $0x1d8] sm:$0xff]  ;;  %3156 = vst [vmem:[#allocation14_spill] sm:$0xff] %v2682_v48  ;;  %3157 = vst [vmem:[#allocation15_spill] sm:$0xff] %v2685_v61  ;;  %v2688_v2 = vld [vmem:[#allocation3 + $0x90] sm:$0xff] }
 0x402   :  { %3158 = vst [vmem:[#allocation16_spill] sm:$0xff] %v2688_v2 }
 0x403   :  { %v2550_v5 = vadd.f32 %v976_v44, %v975_v4  ;;  %v2694_v44 = vld [vmem:[#allocation3 + $0x78] sm:$0xff]  ;;  %v2697_v4 = vld [vmem:[#allocation3 + $0x60] sm:$0xff] }
 0x404   :  { %3160 = vst [vmem:[#allocation18_spill] sm:$0xff] %v2694_v44  ;;  %3161 = vst [vmem:[#allocation19_spill] sm:$0xff] %v2697_v4 }
 0x405   :  { %1786 = vtanh.f32 %v2550_v5 }
 0x412   :  { %v1787_v7 = vpop.eup %1786 }
 0x413   :  { %v979_v8 = vmul.f32 %v1787_v7, %v1785_v6  ;;  %v2700_v6 = vld [vmem:[#allocation3 + $0x70] sm:$0xff]  ;;  %v2703_v7 = vld [vmem:[#allocation3 + $0x48] sm:$0xff] }
 0x414   :  { %3162 = vst [vmem:[#allocation20_spill] sm:$0xff] %v2700_v6  ;;  %3163 = vst [vmem:[#allocation21_spill] sm:$0xff] %v2703_v7 }
 0x415   :  { %1049 = vmatmul.mubr.f32.vlgmr.msra.gmra.mxu0 %v979_v8  ;;  %1120 = vmatmul.mubr.f32.vlgmr.msra.gmra.mxu1 %v979_v8  ;;  %v2706_v8 = vld [vmem:[#allocation3 + $0x58] sm:$0xff] }
 0x416   :  { %1159 = vmatpush1.msra.mxu0 %v2553_v9  ;;  %1230 = vmatpush1.msra.mxu1 %v2556_v10  ;;  %3164 = vst [vmem:[#allocation22_spill] sm:$0xff] %v2706_v8 }
 0x417   :  { %1160 = vmatprep.subr.mxu0 %v2559_v11  ;;  %1231 = vmatprep.subr.mxu1 %v2562_v51 }
 0x418   :  { %1161 = vmatpush1.msra.mxu0 %v2565_v12  ;;  %1232 = vmatpush1.msra.mxu1 %v2568_v13 }
 0x419   :  { %1162 = vmatprep.subr.mxu0 %v2571_v14  ;;  %1233 = vmatprep.subr.mxu1 %v2574_v15 }
 0x41a   :  { %1163 = vmatpush1.msra.mxu0 %v2577_v16  ;;  %1234 = vmatpush1.msra.mxu1 %v2580_v17 }
 0x41b   :  { %1164 = vmatprep.subr.mxu0 %v2583_v18  ;;  %1235 = vmatprep.subr.mxu1 %v2586_v19 }
 0x41c   :  { %1165 = vmatpush1.msra.mxu0 %v2589_v20  ;;  %1236 = vmatpush1.msra.mxu1 %v2592_v21 }
 0x41d   :  { %1166 = vmatprep.subr.mxu0 %v2595_v22  ;;  %1237 = vmatprep.subr.mxu1 %v2598_v23 }
 0x41e   :  { %1167 = vmatpush1.msra.mxu0 %v2601_v24  ;;  %1238 = vmatpush1.msra.mxu1 %v2604_v26 }
 0x41f   :  { %1168 = vmatprep.subr.mxu0 %v2607_v29  ;;  %1239 = vmatprep.subr.mxu1 %v2610_v31 }
 0x420   :  { %1169 = vmatpush1.msra.mxu0 %v2613_v33  ;;  %1240 = vmatpush1.msra.mxu1 %v2616_v34 }
 0x421   :  { %1170 = vmatprep.subr.mxu0 %v2619_v35  ;;  %1241 = vmatprep.subr.mxu1 %v2622_v36 }
 0x422   :  { %1171 = vmatpush1.msra.mxu0 %v2625_v38  ;;  %1242 = vmatpush1.msra.mxu1 %v2628_v39 }
 0x423   :  { %1172 = vmatprep.subr.mxu0 %v2631_v40  ;;  %1243 = vmatprep.subr.mxu1 %v2634_v41 }
 0x424   :  { %1173 = vmatpush1.msra.mxu0 %v2637_v42  ;;  %1244 = vmatpush1.msra.mxu1 %v2640_v43 }
 0x425   :  { %1174 = vmatprep.subr.mxu0 %v2643_v0  ;;  %1245 = vmatprep.subr.mxu1 %v2646_v62 }
 0x426   :  { %1175 = vmatpush1.msra.mxu0 %v2649_v55  ;;  %1246 = vmatpush1.msra.mxu1 %v2652_v56 }
 0x427   :  { %1176 = vmatprep.subr.mxu0 %v2655_v63  ;;  %1247 = vmatprep.subr.mxu1 %v2658_v54 }
 0x428   :  { %1177 = vmatpush1.msra.mxu0 %v2661_v1  ;;  %1248 = vmatpush1.msra.mxu1 %v2664_v49 }
 0x429   :  { %1178 = vmatprep.subr.mxu0 %v2667_v46  ;;  %1249 = vmatprep.subr.mxu1 %v2670_v59 }
 0x42a   :  { %1179 = vmatpush1.msra.mxu0 %v2673_v47  ;;  %1250 = vmatpush1.msra.mxu1 %v2676_v57 }
 0x42b   :  { %1180 = vmatprep.subr.mxu0 %v2679_v50  ;;  %1251 = vmatprep.subr.mxu1 %v2682_v48 }
 0x42c   :  { %1181 = vmatpush1.msra.mxu0 %v2685_v61  ;;  %1252 = vmatpush1.msra.mxu1 %v2688_v2 }
 0x42d   :  { %1182 = vmatprep.subr.mxu0 %v2691_v58  ;;  %1253 = vmatprep.subr.mxu1 %v2694_v44  ;;  %v2709_v58 = vld [vmem:[#allocation3 + $0x40] sm:$0xff]  ;;  %v2712_v44 = vld [vmem:[#allocation3 + $0x50] sm:$0xff] }
 0x42e   :  { %1183 = vmatpush1.msra.mxu0 %v2697_v4  ;;  %1254 = vmatpush1.msra.mxu1 %v2700_v6  ;;  %3165 = vst [vmem:[#allocation23_spill] sm:$0xff] %v2709_v58  ;;  %3166 = vst [vmem:[#allocation24_spill] sm:$0xff] %v2712_v44  ;;  %v2715_v4 = vld [vmem:[#allocation3 + $0x28] sm:$0xff]  ;;  %v2718_v6 = vld [vmem:[#allocation3 + $0x38] sm:$0xff] }
 0x42f   :  { %1184 = vmatprep.subr.mxu0 %v2703_v7  ;;  %1255 = vmatprep.subr.mxu1 %v2706_v8  ;;  %3167 = vst [vmem:[#allocation25_spill] sm:$0xff] %v2715_v4  ;;  %3168 = vst [vmem:[#allocation26_spill] sm:$0xff] %v2718_v6  ;;  %v2721_v7 = vld [vmem:[#allocation3 + $0x20] sm:$0xff]  ;;  %v2724_v8 = vld [vmem:[#allocation3 + $0x30] sm:$0xff] }
 0x430   :  { %1185 = vmatpush1.msra.mxu0 %v2709_v58  ;;  %1256 = vmatpush1.msra.mxu1 %v2712_v44  ;;  %3169 = vst [vmem:[#allocation27_spill] sm:$0xff] %v2721_v7  ;;  %3170 = vst [vmem:[#allocation28_spill] sm:$0xff] %v2724_v8  ;;  %v2727_v58 = vld [vmem:[#allocation3 + $0x8] sm:$0xff]  ;;  %v2730_v44 = vld [vmem:[#allocation3 + $0x18] sm:$0xff] }
 0x431   :  { %1186 = vmatprep.subr.mxu0 %v2715_v4  ;;  %1257 = vmatprep.subr.mxu1 %v2718_v6  ;;  %3171 = vst [vmem:[#allocation29_spill] sm:$0xff] %v2727_v58  ;;  %3172 = vst [vmem:[#allocation30_spill] sm:$0xff] %v2730_v44  ;;  %v2733_v4 = vld [vmem:[#allocation3] sm:$0xff]  ;;  %v2737_v6 = vld [vmem:[#allocation3 + $0x10] sm:$0xff] }
 0x432   :  { %1187 = vmatpush1.msra.mxu0 %v2721_v7  ;;  %1258 = vmatpush1.msra.mxu1 %v2724_v8  ;;  %3173 = vst [vmem:[#allocation31_spill] sm:$0xff] %v2733_v4  ;;  %3174 = vst [vmem:[#allocation32_spill] sm:$0xff] %v2737_v6 }
 0x433   :  { %1188 = vmatprep.subr.mxu0 %v2727_v58  ;;  %1259 = vmatprep.subr.mxu1 %v2730_v44  ;;  %v64_v58 = vpop.permute.xlu0 %63 }
 0x434   :  { %1189 = vmatpush1.msra.mxu0 %v2733_v4  ;;  %1222 = vmatprep.mubr.f32.mxu0 %v3145_v25  ;;  %v118_v8 = vmul.f32 %v3149_v30, %v64_v58  ;;  %v119_v44 = vmul.f32 %v3150_v32, %v64_v58  ;;  %v120_v32 = vmul.f32 %v2293_v45, %v64_v58 }
 0x435   :  { %1260 = vmatpush1.msra.mxu1 %v2737_v6  ;;  %1293 = vmatprep.mubr.f32.mxu1 %v3145_v25 }
 0x436   :  { %1332 = vmatprep.subr.mxu0 %v2535_v27  ;;  %1403 = vmatprep.subr.mxu1 %v2538_v28  ;;  %v172_v7 = vadd.f32 %v2281_v3, %v118_v8  ;;  %v173_v61 = vadd.f32 %v3151_v37, %v119_v44  ;;  %v121_v27 = vmul.f32 %v2288_v53, %v64_v58  ;;  %v3178_v58 = vld [vmem:[#allocation14_spill] sm:$0xff] }
 0x437   :  { %v174_v8 = vadd.f32 %v2297_v52, %v120_v32 }
 0x438   :  { %v175_v30 = vadd.f32 %v3152_v60, %v121_v27 }
 0x4d5   :  { %v1050_v4 = vpop.f32.mrf.mxu0  ;;  %v1121_v25 = vpop.f32.mrf.mxu1 }
 0x4d6   :  { %v1126_v2 = vadd.f32 %v1050_v4, %v172_v7  ;;  %v1128_v44 = vadd.f32 %v1121_v25, %v174_v8  ;;  %v3179_v8 = vld [vmem:[#allocation15_spill] sm:$0xff] }
 0x4d7   :  { %v1052_v48 = vpop.f32.mrf.mxu0  ;;  %v1123_v28 = vpop.f32.mrf.mxu1 }
 0x4d8   :  { %v1704_v50 = vmul.f32 -1.442695, %v1126_v2  ;;  %v1127_v6 = vadd.f32 %v1052_v48, %v173_v61  ;;  %v1129_v47 = vadd.f32 %v1123_v28, %v175_v30 }
 0x4da   :  { %1788 = vpow2.f32 %v1704_v50  ;;  %v1705_v57 = vmul.f32 -1.442695, %v1127_v6  ;;  %v1706_v4 = vmul.f32 -1.442695, %v1129_v47 }
 0x4dc   :  { %1790 = vpow2.f32 %v1705_v57 }
 0x4dd   :  { %1792 = vpow2.f32 %v1706_v4  ;;  %v3180_v4 = vld [vmem:[#allocation16_spill] sm:$0xff] }
 0x4e7   :  { %v1789_v7 = vpop.eup %1788 }
 0x4e8   :  { %v1133_v37 = vadd.f32 1.0, %v1789_v7  ;;  %v3181_v7 = vld [vmem:[#allocation17_spill] sm:$0xff] }
 0x4e9   :  { %v1791_v2 = vpop.eup %1790 }
 0x4ea   :  { %1794 = vrcp.f32 %v1133_v37  ;;  %v1139_v50 = vadd.f32 1.0, %v1791_v2  ;;  %v1793_v48 = vpop.eup %1792  ;;  %v3175_v37 = vld [vmem:[#allocation11_spill] sm:$0xff] }
 0x4eb   :  { %1796 = vtanh.f32 %v1128_v44  ;;  %v1146_v27 = vadd.f32 1.0, %v1793_v48  ;;  %v3182_v44 = vld [vmem:[#allocation18_spill] sm:$0xff]  ;;  %v3183_v2 = vld [vmem:[#allocation19_spill] sm:$0xff]  ;;  %v3185_v48 = vld [vmem:[#allocation21_spill] sm:$0xff] }
 0x4ec   :  { %1798 = vrcp.f32 %v1139_v50  ;;  %v3184_v50 = vld [vmem:[#allocation20_spill] sm:$0xff] }
 0x4ed   :  { %1800 = vrcp.f32 %v1146_v27  ;;  %v3189_v27 = vld [vmem:[#allocation25_spill] sm:$0xff] }
 0x4f7   :  { %v1795_v57 = vpop.eup %1794 }
 0x4f8   :  { %v1797_v61 = vpop.eup %1796 }
 0x4f9   :  { %v1799_v6 = vpop.eup %1798  ;;  %v1150_v60 = vmul.f32 %v1797_v61, %v1795_v57  ;;  %v3186_v57 = vld [vmem:[#allocation22_spill] sm:$0xff]  ;;  %v3187_v61 = vld [vmem:[#allocation23_spill] sm:$0xff] }
 0x4fa   :  { %v1149_v28 = vmul.f32 %v1799_v6, %v2550_v5  ;;  %v1801_v25 = vpop.eup %1800  ;;  %v3177_v5 = vld [vmem:[#allocation13_spill] sm:$0xff]  ;;  %v3188_v6 = vld [vmem:[#allocation24_spill] sm:$0xff] }
 0x4fc   :  { %v2752_v30 = vadd.f32 %v1150_v60, %v1149_v28  ;;  %v3176_v60 = vld [vmem:[#allocation12_spill] sm:$0xff]  ;;  %v3190_v28 = vld [vmem:[#allocation26_spill] sm:$0xff] }
 0x4fe   :  { %1802 = vtanh.f32 %v2752_v30 }
 0x50b   :  { %v1803_v32 = vpop.eup %1802 }
 0x50c   :  { %v1153_v47 = vmul.f32 %v1803_v32, %v1801_v25  ;;  %v3191_v25 = vld [vmem:[#allocation27_spill] sm:$0xff]  ;;  %v3192_v32 = vld [vmem:[#allocation28_spill] sm:$0xff] }
 0x50e   :  { %1223 = vmatmul.mubr.f32.vlgmr.msra.gmra.mxu0 %v1153_v47  ;;  %1294 = vmatmul.mubr.f32.vlgmr.msra.gmra.mxu1 %v1153_v47  ;;  %v3193_v47 = vld [vmem:[#allocation29_spill] sm:$0xff] }
 0x50f   :  { %1333 = vmatpush1.msra.mxu0 %v2553_v9  ;;  %1404 = vmatpush1.msra.mxu1 %v2556_v10 }
 0x510   :  { %1334 = vmatprep.subr.mxu0 %v2559_v11  ;;  %1405 = vmatprep.subr.mxu1 %v2562_v51 }
 0x511   :  { %1335 = vmatpush1.msra.mxu0 %v2565_v12  ;;  %1406 = vmatpush1.msra.mxu1 %v2568_v13 }
 0x512   :  { %1336 = vmatprep.subr.mxu0 %v2571_v14  ;;  %1407 = vmatprep.subr.mxu1 %v2574_v15 }
 0x513   :  { %1337 = vmatpush1.msra.mxu0 %v2577_v16  ;;  %1408 = vmatpush1.msra.mxu1 %v2580_v17 }
 0x514   :  { %1338 = vmatprep.subr.mxu0 %v2583_v18  ;;  %1409 = vmatprep.subr.mxu1 %v2586_v19 }
 0x515   :  { %1339 = vmatpush1.msra.mxu0 %v2589_v20  ;;  %1410 = vmatpush1.msra.mxu1 %v2592_v21 }
 0x516   :  { %1340 = vmatprep.subr.mxu0 %v2595_v22  ;;  %1411 = vmatprep.subr.mxu1 %v2598_v23 }
 0x517   :  { %1341 = vmatpush1.msra.mxu0 %v2601_v24  ;;  %1412 = vmatpush1.msra.mxu1 %v2604_v26 }
 0x518   :  { %1342 = vmatprep.subr.mxu0 %v2607_v29  ;;  %1413 = vmatprep.subr.mxu1 %v2610_v31 }
 0x519   :  { %1343 = vmatpush1.msra.mxu0 %v2613_v33  ;;  %1414 = vmatpush1.msra.mxu1 %v2616_v34 }
 0x51a   :  { %1344 = vmatprep.subr.mxu0 %v2619_v35  ;;  %1415 = vmatprep.subr.mxu1 %v2622_v36 }
 0x51b   :  { %1345 = vmatpush1.msra.mxu0 %v2625_v38  ;;  %1416 = vmatpush1.msra.mxu1 %v2628_v39 }
 0x51c   :  { %1346 = vmatprep.subr.mxu0 %v2631_v40  ;;  %1417 = vmatprep.subr.mxu1 %v2634_v41 }
 0x51d   :  { %1347 = vmatpush1.msra.mxu0 %v2637_v42  ;;  %1418 = vmatpush1.msra.mxu1 %v2640_v43 }
 0x51e   :  { %1348 = vmatprep.subr.mxu0 %v2643_v0  ;;  %1419 = vmatprep.subr.mxu1 %v2646_v62 }
 0x51f   :  { %1349 = vmatpush1.msra.mxu0 %v2649_v55  ;;  %1420 = vmatpush1.msra.mxu1 %v2652_v56 }
 0x520   :  { %1350 = vmatprep.subr.mxu0 %v2655_v63  ;;  %1421 = vmatprep.subr.mxu1 %v2658_v54 }
 0x521   :  { %1351 = vmatpush1.msra.mxu0 %v2661_v1  ;;  %1422 = vmatpush1.msra.mxu1 %v2664_v49 }
 0x522   :  { %1352 = vmatprep.subr.mxu0 %v2667_v46  ;;  %1423 = vmatprep.subr.mxu1 %v2670_v59 }
 0x523   :  { %1353 = vmatpush1.msra.mxu0 %v3175_v37  ;;  %1424 = vmatpush1.msra.mxu1 %v3176_v60  ;;  %v3203_v60 = vld [vmem:[#allocation36_spill] sm:$0xff] }
 0x524   :  { %1354 = vmatprep.subr.mxu0 %v3177_v5  ;;  %1425 = vmatprep.subr.mxu1 %v3178_v58 }
 0x525   :  { %1355 = vmatpush1.msra.mxu0 %v3179_v8  ;;  %1426 = vmatpush1.msra.mxu1 %v3180_v4 }
 0x526   :  { %1356 = vmatprep.subr.mxu0 %v3181_v7  ;;  %1427 = vmatprep.subr.mxu1 %v3182_v44 }
 0x527   :  { %1357 = vmatpush1.msra.mxu0 %v3183_v2  ;;  %1428 = vmatpush1.msra.mxu1 %v3184_v50  ;;  %v3194_v2 = vld [vmem:[#allocation30_spill] sm:$0xff]  ;;  %v3195_v50 = vld [vmem:[#allocation31_spill] sm:$0xff] }
 0x528   :  { %1358 = vmatprep.subr.mxu0 %v3185_v48  ;;  %1429 = vmatprep.subr.mxu1 %v3186_v57  ;;  %v3196_v48 = vmov 0.0   ;;  %v3197_v57 = vld [vmem:[#allocation32_spill] sm:$0xff] }
 0x529   :  { %1359 = vmatpush1.msra.mxu0 %v3187_v61  ;;  %1430 = vmatpush1.msra.mxu1 %v3188_v6  ;;  %v3198_v6 = vld [vmem:[#allocation9_spill] sm:$0xff] }
 0x52a   :  { %1360 = vmatprep.subr.mxu0 %v3189_v27  ;;  %1431 = vmatprep.subr.mxu1 %v3190_v28  ;;  %v3199_v27 = vld [vmem:[#allocation10_spill] sm:$0xff]  ;;  %v69_v28 = vpop.permute.xlu1 %68 }
 0x52b   :  { %1361 = vmatpush1.msra.mxu0 %v3191_v25  ;;  %1432 = vmatpush1.msra.mxu1 %v3192_v32  ;;  %v3200_v25 = vld [vmem:[#allocation33_spill] sm:$0xff]  ;;  %v3201_v32 = vld [vmem:[#allocation34_spill] sm:$0xff] }
 0x52c   :  { %1362 = vmatprep.subr.mxu0 %v3193_v47  ;;  %1433 = vmatprep.subr.mxu1 %v3194_v2  ;;  %v122_v61 = vmul.f32 %v3200_v25, %v69_v28  ;;  %v123_v44 = vmul.f32 %v3201_v32, %v69_v28  ;;  %v124_v32 = vmul.f32 %v2293_v45, %v69_v28 }
 0x52d   :  { %1363 = vmatpush1.msra.mxu0 %v3195_v50  ;;  %1396 = vmatprep.mubr.f32.mxu0 %v3196_v48  ;;  %v3202_v50 = vld [vmem:[#allocation35_spill] sm:$0xff] }
 0x52e   :  { %1434 = vmatpush1.msra.mxu1 %v3197_v57  ;;  %1467 = vmatprep.mubr.f32.mxu1 %v3196_v48  ;;  %v176_v47 = vadd.f32 %v2281_v3, %v122_v61  ;;  %v177_v4 = vadd.f32 %v3202_v50, %v123_v44  ;;  %v178_v61 = vadd.f32 %v2297_v52, %v124_v32 }
 0x52f   :  { %1506 = vmatprep.subr.mxu0 %v3198_v6  ;;  %1577 = vmatprep.subr.mxu1 %v3199_v27  ;;  %v125_v6 = vmul.f32 %v2288_v53, %v69_v28 }
 0x531   :  { %v179_v25 = vadd.f32 %v3203_v60, %v125_v6 }
 0x5ce   :  { %v1224_v2 = vpop.f32.mrf.mxu0  ;;  %v1295_v48 = vpop.f32.mrf.mxu1 }
 0x5cf   :  { %v1300_v7 = vadd.f32 %v1224_v2, %v176_v47  ;;  %v1302_v44 = vadd.f32 %v1295_v48, %v178_v61 }
 0x5d0   :  { %v1226_v8 = vpop.f32.mrf.mxu0  ;;  %v1297_v27 = vpop.f32.mrf.mxu1 }
 0x5d1   :  { %v1707_v58 = vmul.f32 -1.442695, %v1300_v7  ;;  %v1301_v57 = vadd.f32 %v1226_v8, %v177_v4  ;;  %v1303_v37 = vadd.f32 %v1297_v27, %v179_v25 }
 0x5d3   :  { %1804 = vpow2.f32 %v1707_v58  ;;  %v1708_v5 = vmul.f32 -1.442695, %v1301_v57  ;;  %v1709_v2 = vmul.f32 -1.442695, %v1303_v37 }
 0x5d5   :  { %1806 = vpow2.f32 %v1708_v5 }
 0x5d6   :  { %1808 = vpow2.f32 %v1709_v2 }
 0x5e0   :  { %v1805_v47 = vpop.eup %1804 }
 0x5e1   :  { %v1307_v50 = vadd.f32 1.0, %v1805_v47 }
 0x5e2   :  { %v1807_v7 = vpop.eup %1806 }
 0x5e3   :  { %1810 = vrcp.f32 %v1307_v50  ;;  %v1313_v58 = vadd.f32 1.0, %v1807_v7  ;;  %v1809_v8 = vpop.eup %1808 }
 0x5e4   :  { %1812 = vtanh.f32 %v1302_v44  ;;  %v1320_v6 = vadd.f32 1.0, %v1809_v8 }
 0x5e5   :  { %1814 = vrcp.f32 %v1313_v58 }
 0x5e6   :  { %1816 = vrcp.f32 %v1320_v6 }
 0x5f0   :  { %v1811_v5 = vpop.eup %1810 }
 0x5f1   :  { %v1813_v4 = vpop.eup %1812 }
 0x5f2   :  { %v1815_v57 = vpop.eup %1814  ;;  %v1324_v60 = vmul.f32 %v1813_v4, %v1811_v5 }
 0x5f3   :  { %v1323_v28 = vmul.f32 %v1815_v57, %v2752_v30  ;;  %v1817_v37 = vpop.eup %1816  ;;  %v3230_v30 = vld [vmem:[#allocation36_spill] sm:$0xff] }
 0x5f5   :  { %v2830_v25 = vadd.f32 %v1324_v60, %v1323_v28 }
 0x5f7   :  { %1818 = vtanh.f32 %v2830_v25 }
 0x604   :  { %v1819_v48 = vpop.eup %1818 }
 0x605   :  { %v1327_v32 = vmul.f32 %v1819_v48, %v1817_v37 }
 0x607   :  { %1397 = vmatmul.mubr.f32.vlgmr.msra.gmra.mxu0 %v1327_v32  ;;  %1468 = vmatmul.mubr.f32.vlgmr.msra.gmra.mxu1 %v1327_v32 }
 0x608   :  { %1507 = vmatpush1.msra.mxu0 %v2553_v9  ;;  %1578 = vmatpush1.msra.mxu1 %v2556_v10  ;;  %v3204_v9 = vld [vmem:[#allocation11_spill] sm:$0xff]  ;;  %v3205_v10 = vld [vmem:[#allocation12_spill] sm:$0xff] }
 0x609   :  { %1508 = vmatprep.subr.mxu0 %v2559_v11  ;;  %1579 = vmatprep.subr.mxu1 %v2562_v51  ;;  %v3206_v11 = vld [vmem:[#allocation13_spill] sm:$0xff]  ;;  %v3207_v51 = vld [vmem:[#allocation14_spill] sm:$0xff] }
 0x60a   :  { %1509 = vmatpush1.msra.mxu0 %v2565_v12  ;;  %1580 = vmatpush1.msra.mxu1 %v2568_v13  ;;  %v3208_v12 = vld [vmem:[#allocation15_spill] sm:$0xff]  ;;  %v3209_v13 = vld [vmem:[#allocation16_spill] sm:$0xff] }
 0x60b   :  { %1510 = vmatprep.subr.mxu0 %v2571_v14  ;;  %1581 = vmatprep.subr.mxu1 %v2574_v15  ;;  %v3210_v14 = vld [vmem:[#allocation17_spill] sm:$0xff]  ;;  %v3211_v15 = vld [vmem:[#allocation18_spill] sm:$0xff] }
 0x60c   :  { %1511 = vmatpush1.msra.mxu0 %v2577_v16  ;;  %1582 = vmatpush1.msra.mxu1 %v2580_v17  ;;  %v3212_v16 = vld [vmem:[#allocation19_spill] sm:$0xff]  ;;  %v3213_v17 = vld [vmem:[#allocation20_spill] sm:$0xff] }
 0x60d   :  { %1512 = vmatprep.subr.mxu0 %v2583_v18  ;;  %1583 = vmatprep.subr.mxu1 %v2586_v19  ;;  %v3214_v18 = vld [vmem:[#allocation21_spill] sm:$0xff]  ;;  %v3215_v19 = vld [vmem:[#allocation22_spill] sm:$0xff] }
 0x60e   :  { %1513 = vmatpush1.msra.mxu0 %v2589_v20  ;;  %1584 = vmatpush1.msra.mxu1 %v2592_v21  ;;  %v3216_v20 = vld [vmem:[#allocation23_spill] sm:$0xff]  ;;  %v3217_v21 = vld [vmem:[#allocation24_spill] sm:$0xff] }
 0x60f   :  { %1514 = vmatprep.subr.mxu0 %v2595_v22  ;;  %1585 = vmatprep.subr.mxu1 %v2598_v23  ;;  %v3218_v22 = vld [vmem:[#allocation25_spill] sm:$0xff]  ;;  %v3219_v23 = vld [vmem:[#allocation26_spill] sm:$0xff] }
 0x610   :  { %1515 = vmatpush1.msra.mxu0 %v2601_v24  ;;  %1586 = vmatpush1.msra.mxu1 %v2604_v26  ;;  %v3220_v24 = vld [vmem:[#allocation27_spill] sm:$0xff]  ;;  %v3221_v26 = vld [vmem:[#allocation28_spill] sm:$0xff] }
 0x611   :  { %1516 = vmatprep.subr.mxu0 %v2607_v29  ;;  %1587 = vmatprep.subr.mxu1 %v2610_v31  ;;  %v3222_v29 = vld [vmem:[#allocation29_spill] sm:$0xff]  ;;  %v3223_v31 = vld [vmem:[#allocation30_spill] sm:$0xff] }
 0x612   :  { %1517 = vmatpush1.msra.mxu0 %v2613_v33  ;;  %1588 = vmatpush1.msra.mxu1 %v2616_v34  ;;  %v3224_v33 = vld [vmem:[#allocation31_spill] sm:$0xff]  ;;  %v3225_v34 = vmov 0.0  }
 0x613   :  { %1518 = vmatprep.subr.mxu0 %v2619_v35  ;;  %1589 = vmatprep.subr.mxu1 %v2622_v36  ;;  %v3226_v35 = vld [vmem:[#allocation32_spill] sm:$0xff]  ;;  %v74_v36 = vpop.permute.xlu0 %73 }
 0x614   :  { %1519 = vmatpush1.msra.mxu0 %v2625_v38  ;;  %1590 = vmatpush1.msra.mxu1 %v2628_v39  ;;  %v3227_v38 = vld [vmem:[#allocation33_spill] sm:$0xff]  ;;  %v128_v50 = vmul.f32 %v2293_v45, %v74_v36 }
 0x615   :  { %1520 = vmatprep.subr.mxu0 %v2631_v40  ;;  %1591 = vmatprep.subr.mxu1 %v2634_v41  ;;  %v126_v39 = vmul.f32 %v3227_v38, %v74_v36  ;;  %v3228_v40 = vld [vmem:[#allocation34_spill] sm:$0xff] }
 0x616   :  { %1521 = vmatpush1.msra.mxu0 %v2637_v42  ;;  %1592 = vmatpush1.msra.mxu1 %v2640_v43  ;;  %v127_v41 = vmul.f32 %v3228_v40, %v74_v36  ;;  %v182_v61 = vadd.f32 %v2297_v52, %v128_v50 }
 0x617   :  { %1522 = vmatprep.subr.mxu0 %v2643_v0  ;;  %1593 = vmatprep.subr.mxu1 %v2646_v62  ;;  %v180_v42 = vadd.f32 %v2281_v3, %v126_v39  ;;  %v3229_v62 = vld [vmem:[#allocation35_spill] sm:$0xff] }
 0x618   :  { %1523 = vmatpush1.msra.mxu0 %v2649_v55  ;;  %1594 = vmatpush1.msra.mxu1 %v2652_v56  ;;  %v181_v55 = vadd.f32 %v3229_v62, %v127_v41 }
 0x619   :  { %1524 = vmatprep.subr.mxu0 %v2655_v63  ;;  %1595 = vmatprep.subr.mxu1 %v2658_v54 }
 0x61a   :  { %1525 = vmatpush1.msra.mxu0 %v2661_v1  ;;  %1596 = vmatpush1.msra.mxu1 %v2664_v49 }
 0x61b   :  { %1526 = vmatprep.subr.mxu0 %v2667_v46  ;;  %1597 = vmatprep.subr.mxu1 %v2670_v59  ;;  %v129_v46 = vmul.f32 %v2288_v53, %v74_v36 }
 0x61c   :  { %1527 = vmatpush1.msra.mxu0 %v3204_v9  ;;  %1598 = vmatpush1.msra.mxu1 %v3205_v10 }
 0x61d   :  { %1528 = vmatprep.subr.mxu0 %v3206_v11  ;;  %1599 = vmatprep.subr.mxu1 %v3207_v51  ;;  %v183_v60 = vadd.f32 %v3230_v30, %v129_v46  ;;  %v79_v51 = vpop.permute.xlu1 %78 }
 0x61e   :  { %1529 = vmatpush1.msra.mxu0 %v3208_v12  ;;  %1600 = vmatpush1.msra.mxu1 %v3209_v13  ;;  %v130_v12 = vmul.f32 %v3227_v38, %v79_v51  ;;  %v131_v13 = vmul.f32 %v3228_v40, %v79_v51 }
 0x61f   :  { %1530 = vmatprep.subr.mxu0 %v3210_v14  ;;  %1601 = vmatprep.subr.mxu1 %v3211_v15 }
 0x620   :  { %1531 = vmatpush1.msra.mxu0 %v3212_v16  ;;  %1602 = vmatpush1.msra.mxu1 %v3213_v17  ;;  %v184_v14 = vadd.f32 %v2281_v3, %v130_v12  ;;  %v185_v17 = vadd.f32 %v3229_v62, %v131_v13 }
 0x621   :  { %1532 = vmatprep.subr.mxu0 %v3214_v18  ;;  %1603 = vmatprep.subr.mxu1 %v3215_v19 }
 0x622   :  { %1533 = vmatpush1.msra.mxu0 %v3216_v20  ;;  %1604 = vmatpush1.msra.mxu1 %v3217_v21 }
 0x623   :  { %1534 = vmatprep.subr.mxu0 %v3218_v22  ;;  %1605 = vmatprep.subr.mxu1 %v3219_v23  ;;  %v133_v22 = vmul.f32 %v2288_v53, %v79_v51 }
 0x624   :  { %1535 = vmatpush1.msra.mxu0 %v3220_v24  ;;  %1606 = vmatpush1.msra.mxu1 %v3221_v26  ;;  %v132_v26 = vmul.f32 %v2293_v45, %v79_v51 }
 0x625   :  { %1536 = vmatprep.subr.mxu0 %v3222_v29  ;;  %1607 = vmatprep.subr.mxu1 %v3223_v31  ;;  %v187_v24 = vadd.f32 %v3230_v30, %v133_v22 }
 0x626   :  { %1537 = vmatpush1.msra.mxu0 %v3224_v33  ;;  %1570 = vmatprep.mubr.f32.mxu0 %v3225_v34  ;;  %v186_v3 = vadd.f32 %v2297_v52, %v132_v26 }
 0x627   :  { %1608 = vmatpush1.msra.mxu1 %v3226_v35  ;;  %1641 = vmatprep.mubr.f32.mxu1 %v3225_v34 }
 0x6c7   :  { %v1398_v43 = vpop.f32.mrf.mxu0  ;;  %v1469_v1 = vpop.f32.mrf.mxu1 }
 0x6c8   :  { %v1474_v0 = vadd.f32 %v1398_v43, %v180_v42  ;;  %v1476_v44 = vadd.f32 %v1469_v1, %v182_v61 }
 0x6c9   :  { %v1400_v56 = vpop.f32.mrf.mxu0  ;;  %v1471_v59 = vpop.f32.mrf.mxu1 }
 0x6ca   :  { %v1710_v63 = vmul.f32 -1.442695, %v1474_v0  ;;  %v1475_v54 = vadd.f32 %v1400_v56, %v181_v55  ;;  %v1477_v27 = vadd.f32 %v1471_v59, %v183_v60 }
 0x6cc   :  { %1820 = vpow2.f32 %v1710_v63  ;;  %v1711_v49 = vmul.f32 -1.442695, %v1475_v54  ;;  %v1712_v2 = vmul.f32 -1.442695, %v1477_v27 }
 0x6ce   :  { %1822 = vpow2.f32 %v1711_v49 }
 0x6cf   :  { %1824 = vpow2.f32 %v1712_v2 }
 0x6d9   :  { %v1821_v47 = vpop.eup %1820 }
 0x6da   :  { %v1481_v7 = vadd.f32 1.0, %v1821_v47 }
 0x6db   :  { %v1823_v58 = vpop.eup %1822 }
 0x6dc   :  { %1826 = vrcp.f32 %v1481_v7  ;;  %v1487_v8 = vadd.f32 1.0, %v1823_v58  ;;  %v1825_v5 = vpop.eup %1824 }
 0x6dd   :  { %1828 = vtanh.f32 %v1476_v44  ;;  %v1494_v28 = vadd.f32 1.0, %v1825_v5 }
 0x6de   :  { %1830 = vrcp.f32 %v1487_v8 }
 0x6df   :  { %1832 = vrcp.f32 %v1494_v28 }
 0x6e9   :  { %v1827_v4 = vpop.eup %1826 }
 0x6ea   :  { %v1829_v57 = vpop.eup %1828 }
 0x6eb   :  { %v1831_v6 = vpop.eup %1830  ;;  %v1498_v37 = vmul.f32 %v1829_v57, %v1827_v4 }
 0x6ec   :  { %v1497_v48 = vmul.f32 %v1831_v6, %v2830_v25  ;;  %v1833_v9 = vpop.eup %1832 }
 0x6ee   :  { %v1499_v32 = vadd.f32 %v1498_v37, %v1497_v48 }
 0x6f0   :  { %1834 = vtanh.f32 %v1499_v32 }
 0x6fd   :  { %v1835_v10 = vpop.eup %1834 }
 0x6fe   :  { %v1501_v11 = vmul.f32 %v1835_v10, %v1833_v9 }
 0x700   :  { %1571 = vmatmul.mubr.f32.vlgmr.msra.gmra.mxu0 %v1501_v11  ;;  %1642 = vmatmul.mubr.f32.vlgmr.msra.gmra.mxu1 %v1501_v11 }
 0x7c0   :  { %v1572_v15 = vpop.f32.mrf.mxu0  ;;  %v1643_v20 = vpop.f32.mrf.mxu1 }
 0x7c1   :  { %v1648_v16 = vadd.f32 %v1572_v15, %v184_v14  ;;  %v1650_v34 = vadd.f32 %v1643_v20, %v186_v3 }
 0x7c2   :  { %v1574_v25 = vpop.f32.mrf.mxu0  ;;  %v1645_v23 = vpop.f32.mrf.mxu1 }
 0x7c3   :  { %v1713_v18 = vmul.f32 -1.442695, %v1648_v16  ;;  %v1649_v19 = vadd.f32 %v1574_v25, %v185_v17  ;;  %v1651_v29 = vadd.f32 %v1645_v23, %v187_v24 }
 0x7c5   :  { %1836 = vpow2.f32 %v1713_v18  ;;  %v1714_v21 = vmul.f32 -1.442695, %v1649_v19  ;;  %v1715_v31 = vmul.f32 -1.442695, %v1651_v29 }
 0x7c7   :  { %1838 = vpow2.f32 %v1714_v21 }
 0x7c8   :  { %1840 = vpow2.f32 %v1715_v31 }
 0x7d2   :  { %v1837_v33 = vpop.eup %1836 }
 0x7d3   :  { %v1655_v35 = vadd.f32 1.0, %v1837_v33 }
 0x7d4   :  { %v1839_v36 = vpop.eup %1838 }
 0x7d5   :  { %1842 = vrcp.f32 %v1655_v35  ;;  %v1661_v38 = vadd.f32 1.0, %v1839_v36  ;;  %v1841_v53 = vpop.eup %1840 }
 0x7d6   :  { %1844 = vtanh.f32 %v1650_v34  ;;  %v1668_v42 = vadd.f32 1.0, %v1841_v53 }
 0x7d7   :  { %1846 = vrcp.f32 %v1661_v38 }
 0x7d8   :  { %1848 = vrcp.f32 %v1668_v42 }
 0x7e2   :  { %v1843_v39 = vpop.eup %1842 }
 0x7e3   :  { %v1845_v40 = vpop.eup %1844 }
 0x7e4   :  { %v1847_v41 = vpop.eup %1846  ;;  %v1672_v43 = vmul.f32 %v1845_v40, %v1843_v39 }
 0x7e5   :  { %v1671_v45 = vmul.f32 %v1847_v41, %v1499_v32  ;;  %v1849_v52 = vpop.eup %1848 }
 0x7e7   :  { %v1673_v0 = vadd.f32 %v1672_v43, %v1671_v45 }
 0x7e9   :  { %1850 = vtanh.f32 %v1673_v0 }
 0x7f6   :  { %v1851_v62 = vpop.eup %1850 }
 0x7f7   :  { %v1675_v55 = vmul.f32 %v1851_v62, %v1849_v52 }
 0x7f9   :  { %1676 = vst [vmem:[#allocation6] sm:$0xff] %v1675_v55 }
 0x7fa   :  { %1947 = shalt.err (!%p1944_p9)
}
 0x7fb   :  { %1686 = dma.vmem_to_hbm [thread:$0]  %s1684_s13, 128, %s2921_s4, [#allocation5]  }
 0x7fc   :  { %1958 = dma.done.wait [#allocation5], 128  }
 0x7fd   :  { %1959 = vsyncadd [#allocation5], 4294967168 }
 0x7fe   :  { %1690 = vsyncpa [#allocation4], 1 }
 0x7ff   :  { %1691 = vsyncpa [#allocation5], 1 }

</bundles_post_ra>
